<compile_context>
chip_gen: v7x
topology: tpu7x:2x2x1
jax: 0.10.0
libtpu: 0.0.40
codegen_flags: <defaults>
</compile_context>

<pallas_src>
import functools

import jax
import jax.numpy as jnp
from jax.experimental import pallas as pl
from jax.experimental.pallas import tpu as pltpu


# -----------------------------------------------------------------------------
# Hardware-dependent sizing
# -----------------------------------------------------------------------------
def _tpu_flavor():
    """Returns (compute dtype for the add/tanh path, vmem_limit_bytes, tile budget)."""
    kind = ""
    try:
        kind = jax.devices()[0].device_kind.lower()
    except Exception:
        pass
    is_v5 = "v5" in kind
    big_vmem = ("v5" in kind) or ("v6" in kind)          # 128 MiB per TensorCore
    try:                                                 # exact number when exposed
        big_vmem = int(pltpu.get_tpu_info().vmem_capacity_bytes) >= (96 << 20)
    except Exception:
        pass
    # v5e has no bf16 VPU/EUP: keep the elementwise add/tanh path in f32 there.
    compute_dtype = jnp.float32 if is_v5 else jnp.bfloat16
    if big_vmem:
        return compute_dtype, 100 << 20, 20 << 20        # v5e / v6e
    return compute_dtype, 48 << 20, 8 << 20              # v7x / unknown: conservative


def _choose_pred_tile(s_part, s_full, H, cdt_bytes, tile_budget):
    """Largest predicate tile dividing s_part, (8,128)-legal, fitting the budget."""
    LC = 128 if (H > 128 and H % 128 == 0) else H
    # f32 streaming accumulator + one tanh chunk tile, per predicate row.
    per_row = s_full * LC * (4 + cdt_bytes)
    cands = [t for t in range(1, s_part + 1)
             if s_part % t == 0 and (t % 8 == 0 or t == s_full)]
    fitting = [t for t in cands if t * per_row <= tile_budget]
    if not fitting:
        raise ValueError(
            f"pas_head_pallas: no predicate tile fits the VMEM tile budget "
            f"(S={s_full}, H={H}, budget={tile_budget} B); reduce S/H or raise it.")
    preferred = [t for t in fitting if t % 16 == 0 or t == s_full]  # bf16 sublane pack
    return max(preferred) if preferred else max(fitting)


# -----------------------------------------------------------------------------
# Pallas kernel: PAS scoring head
#   score[p, c, a] = w_out . tanh(h_prd[p, c, :] + h_arg[a, c, :]) + bias[p, c, a]
#   h_prd = l_prd(seq), h_arg = l_arg(seq) (+ context, broadcast over cases)
#   bias  = 0 where allowed, -1024 where masked
# Grid: (batch, pred_split, pred_tile).  Projections live in per-core VMEM
# scratch across predicate tiles; the H-reduction is streamed in 128-lane chunks.
# -----------------------------------------------------------------------------
def _pas_head_kernel(*refs, has_context):
    if has_context:
        (seq_ref, ctx_ref, wprd_ref, bprd_ref, warg_ref, barg_ref,
         wout_ref, bias_ref, out_ref, hp_scr, ha_scr, acc_scr) = refs
    else:
        ctx_ref = None
        (seq_ref, wprd_ref, bprd_ref, warg_ref, barg_ref,
         wout_ref, bias_ref, out_ref, hp_scr, ha_scr, acc_scr) = refs

    S = seq_ref.shape[1]
    H = wprd_ref.shape[0]
    C = wprd_ref.shape[1] // H
    Tp = out_ref.shape[1]
    n_chunks = hp_scr.shape[1]
    LC = hp_scr.shape[3]
    cdt = hp_scr.dtype                      # bf16 (v6e/v7x) or f32 (v5e)

    ih = pl.program_id(1)                   # predicate split (parallel -> per core)
    ip = pl.program_id(2)                   # predicate tile within split (sequential)
    n_p = pl.num_programs(2)

    # ---- once per (batch, split): project the whole sequence into VMEM scratch.
    # Guarded on the *sequential* axis, so each TensorCore (which owns whole
    # (batch, split) pairs) initializes its own scratch before reading it.
    @pl.when(ip == 0)
    def _():
        seq = seq_ref[0]                                               # (S, H) bf16
        ctx = ctx_ref[0].astype(jnp.float32) if has_context else None
        for c in range(C):                                             # C is small
            col = slice(c * H, (c + 1) * H)
            h_p = jnp.dot(seq, wprd_ref[:, col],
                          preferred_element_type=jnp.float32) + bprd_ref[0, col]
            h_a = jnp.dot(seq, warg_ref[:, col],
                          preferred_element_type=jnp.float32) + barg_ref[0, col]
            if has_context:
                h_a = h_a + ctx
            for k in range(n_chunks):                                  # static 128-lane slabs
                sl = slice(k * LC, (k + 1) * LC)
                hp_scr[c, k] = h_p[:, sl].astype(cdt)
                ha_scr[c, k] = h_a[:, sl].astype(cdt)

    # ---- per predicate tile: streamed tanh + weighted H-reduction -----------
    pred_start = pl.multiple_of((ih * n_p + ip) * Tp, Tp)

    for c in range(C):                                                 # C is small
        def weighted_tanh(k):
            hp = hp_scr[c, k, pl.ds(pred_start, Tp), :]                # (Tp, LC)
            ha = ha_scr[c, k]                                          # (S,  LC)
            w = wout_ref[k].astype(jnp.float32)                        # (LC,)
            t = jnp.tanh(hp[:, None, :] + ha[None, :, :])              # (Tp, S, LC)
            return w * t.astype(jnp.float32)                           # f32 accumulate

        # Chunk 0 initializes the shared accumulator scratch; reusing one scratch
        # across all cases keeps only one (Tp, S, LC) tile live at a time.
        acc_scr[...] = weighted_tanh(0)
        if n_chunks > 1:
            @pl.loop(1, n_chunks)
            def _(k):
                acc_scr[...] += weighted_tanh(k)

        score = jnp.sum(acc_scr[...], axis=-1)                         # (Tp, S) f32
        lane = slice(c * S, (c + 1) * S)
        # PyTorch: output += (~mask) * -1024.0  ==  score + additive bias.
        out_ref[0, :, lane] = score + bias_ref[0, :, lane].astype(jnp.float32)


def pas_head_pallas(seq_out, context, w_prd_t, b_prd, w_arg_t, b_arg, w_out, mask):
    """Masked PAS scores in the PyTorch layout (B, S_pred, C, S_arg).

    `context=None` selects the context-free (coreference head) kernel variant.
    """
    B, S, H = seq_out.shape
    C = w_prd_t.shape[1] // H
    has_context = context is not None

    compute_dtype, vmem_limit, tile_budget = _tpu_flavor()
    cdt_bytes = jnp.dtype(compute_dtype).itemsize
    LC = 128 if (H > 128 and H % 128 == 0) else H
    n_chunks = H // LC

    # Megacore: when B alone cannot load both TensorCores evenly (odd B, incl.
    # B == 1 on v7x), split the predicate range over a second parallel axis.
    n_split = 2 if (B % 2 == 1 and S % 2 == 0 and (S // 2) % 8 == 0) else 1
    s_part = S // n_split
    Tp = _choose_pred_tile(s_part, S, H, cdt_bytes, tile_budget)
    n_p = s_part // Tp

    seq_bf = seq_out.astype(jnp.bfloat16)
    # Additive mask bias: 0 where allowed, -1024 where masked (exact in bf16).
    bias = ((mask.reshape(B, S, C * S).astype(jnp.float32) - 1.0) * 1024.0
            ).astype(jnp.bfloat16)
    w_out_ck = w_out.reshape(n_chunks, LC).astype(jnp.float32)

    batch3 = lambda b, h, p: (b, 0, 0)
    pred3 = lambda b, h, p: (b, h * n_p + p, 0)
    const2 = lambda b, h, p: (0, 0)
    single = pl.Buffered(1)            # grid-invariant params: no double buffering

    in_specs = [pl.BlockSpec((1, S, H), batch3)]                       # seq
    operands = [seq_bf]
    if has_context:
        in_specs.append(pl.BlockSpec((1, S, H), batch3))               # context
        operands.append(context.astype(jnp.bfloat16))
    in_specs += [
        pl.BlockSpec((H, C * H), const2, pipeline_mode=single),        # w_prd
        pl.BlockSpec((1, C * H), const2, pipeline_mode=single),        # b_prd
        pl.BlockSpec((H, C * H), const2, pipeline_mode=single),        # w_arg
        pl.BlockSpec((1, C * H), const2, pipeline_mode=single),        # b_arg
        pl.BlockSpec((n_chunks, LC), const2, pipeline_mode=single),    # w_out
        pl.BlockSpec((1, Tp, C * S), pred3),                           # mask bias
    ]
    operands += [
        w_prd_t.astype(jnp.bfloat16),
        b_prd.reshape(1, C * H).astype(jnp.float32),
        w_arg_t.astype(jnp.bfloat16),
        b_arg.reshape(1, C * H).astype(jnp.float32),
        w_out_ck,
        bias,
    ]

    in_bytes = sum(int(x.size) * jnp.dtype(x.dtype).itemsize for x in operands)
    cost = pl.CostEstimate(
        flops=int(4 * B * n_split * S * C * H * H       # hoisted projections
                  + 3 * B * S * S * C * H),             # add + weighted accumulate
        transcendentals=int(B * S * S * C * H),         # tanh (EUP-bound)
        bytes_accessed=int(in_bytes + B * S * C * S * 4))

    out = pl.pallas_call(
        functools.partial(_pas_head_kernel, has_context=has_context),
        out_shape=jax.ShapeDtypeStruct((B, S, C * S), jnp.float32),
        grid=(B, n_split, n_p),
        in_specs=in_specs,
        out_specs=pl.BlockSpec((1, Tp, C * S), pred3),
        scratch_shapes=[
            pltpu.VMEM((C, n_chunks, S, LC), compute_dtype),   # h_prd
            pltpu.VMEM((C, n_chunks, S, LC), compute_dtype),   # h_arg (+ context)
            pltpu.VMEM((Tp, S, LC), jnp.float32),              # streaming accumulator
        ],
        compiler_params=pltpu.CompilerParams(
            dimension_semantics=("parallel", "parallel", "arbitrary"),
            vmem_limit_bytes=vmem_limit),
        cost_estimate=cost,
    )(*operands)
    return out.reshape(B, S, C, S)          # free view; (B, S_pred, C, S_arg)


# -----------------------------------------------------------------------------
# Glue: minimal deterministic BERT-style encoder, mask, loss
# -----------------------------------------------------------------------------
def layer_norm(x, g, b, eps=1e-12):
    mu = jnp.mean(x, axis=-1, keepdims=True)
    var = jnp.var(x, axis=-1, keepdims=True)
    return (x - mu) / jnp.sqrt(var + eps) * g + b


def bert_encoder_stub(p, input_ids, attention_mask, segment_ids, n_heads=2):
    # TODO(synk): BertModel.from_pretrained / resize_token_embeddings cannot be
    # loaded here; replaced by a minimal deterministic 1-layer BERT-style encoder.
    B, S = input_ids.shape
    H = p["word_emb"].shape[1]
    dh = H // n_heads
    pos = jnp.arange(S)
    x = (p["word_emb"][input_ids]
         + p["pos_emb"][pos][None, :, :]
         + p["type_emb"][segment_ids])
    x = layer_norm(x, p["ln_emb_g"], p["ln_emb_b"])
    q = (x @ p["wq"] + p["bq"]).reshape(B, S, n_heads, dh).transpose(0, 2, 1, 3)
    k = (x @ p["wk"] + p["bk"]).reshape(B, S, n_heads, dh).transpose(0, 2, 1, 3)
    v = (x @ p["wv"] + p["bv"]).reshape(B, S, n_heads, dh).transpose(0, 2, 1, 3)
    att = jnp.einsum("bhqd,bhkd->bhqk", q, k) / jnp.sqrt(jnp.float32(dh))
    att = att + (1.0 - attention_mask[:, None, None, :].astype(jnp.float32)) * -1e9
    att = jax.nn.softmax(att, axis=-1)
    ctx = jnp.einsum("bhqk,bhkd->bhqd", att, v).transpose(0, 2, 1, 3).reshape(B, S, H)
    x = layer_norm(x + (ctx @ p["wo"] + p["bo"]), p["ln1_g"], p["ln1_b"])
    ff = jax.nn.gelu(x @ p["w_ff1"] + p["b_ff1"]) @ p["w_ff2"] + p["b_ff2"]
    x = layer_norm(x + ff, p["ln2_g"], p["ln2_b"])
    return x


def get_mask(attention_mask, ng_token_mask):
    # (B, S) & (B, S, C, S) -> (B, S, C, S); argument (last) axis gated by attention.
    return jnp.logical_and(ng_token_mask, attention_mask[:, None, None, :].astype(bool))


def cross_entropy_pas_loss(output, target):
    # TODO(synk): exact cross_entropy_pas_loss source not provided; plausible
    # reimplementation (softmax cross-entropy over the argument axis).
    eps = 1e-6
    log_sm = jax.nn.log_softmax(output, axis=3)
    return -jnp.sum(log_sm * target) / (jnp.sum(target) + eps)


# -----------------------------------------------------------------------------
# CoreferenceSeparatedModel forward
# -----------------------------------------------------------------------------
def coreference_separated_forward(params, input_ids, attention_mask, segment_ids,
                                  ng_token_mask, target):
    # Last case index of the mask / target is the coref case.
    ng_others = ng_token_mask[:, :, :-1, :]                     # (B, S, C, S)
    ng_coref = ng_token_mask[:, :, -1:, :]                      # (B, S, 1, S)
    target_others = target[:, :, :-1, :]

    mask_others = get_mask(attention_mask, ng_others)
    mask_coref = get_mask(attention_mask, ng_coref)

    # Main BERT encoder (eval mode: dropout = identity).
    sequence_output = bert_encoder_stub(params["bert_main"], input_ids,
                                        attention_mask, segment_ids)

    # ----- coreference_model (BaselineModel with num_case = 1, frozen / eval) -----
    # TODO(synk): the PyTorch module torch.load's a pretrained checkpoint chosen at
    # random among 5 dates; replaced by deterministic init of the same structure.
    seq_coref = bert_encoder_stub(params["bert_coref"], input_ids,
                                  attention_mask, segment_ids)
    ph = params["coref_head"]
    out_coref = pas_head_pallas(
        seq_coref, None, ph["w_prd_t"], ph["b_prd"],
        ph["w_arg_t"], ph["b_arg"], ph["w_out"], mask_coref)[:, :, 0, :]    # (B, S, S)
    out_coref = jax.lax.stop_gradient(out_coref)                # .detach()

    # ----- coref-attention context (small batched matmuls; plain XLA) -----
    pm = params["main_head"]
    hid_context = sequence_output @ pm["w_ctx_t"] + pm["b_ctx"]             # (B, S, H)
    coref_attn = jax.nn.softmax(out_coref, axis=2)                          # over antecedents
    context = jnp.einsum("bij,bjh->bih", coref_attn, hid_context)           # (B, S, H)

    # ----- main PAS head (Pallas); `h_a += context` happens inside the kernel -----
    output = pas_head_pallas(
        sequence_output, context, pm["w_prd_t"], pm["b_prd"],
        pm["w_arg_t"], pm["b_arg"], pm["w_out"], mask_others)               # (B, S, C, S)

    loss = cross_entropy_pas_loss(output, target_others)
    full_output = jnp.concatenate([output, out_coref[:, :, None, :]], axis=2)
    return loss, full_output


# -----------------------------------------------------------------------------
# Deterministic parameter initialization
# -----------------------------------------------------------------------------
def bert_stub_params(key, vocab_size, max_seq, H):
    ks = jax.random.split(key, 9)
    n = lambda k, s: (0.02 * jax.random.normal(k, s)).astype(jnp.float32)
    z = lambda s: jnp.zeros(s, jnp.float32)
    o = lambda s: jnp.ones(s, jnp.float32)
    return {
        "word_emb": n(ks[0], (vocab_size, H)),
        "pos_emb": n(ks[1], (max_seq, H)),
        "type_emb": n(ks[2], (2, H)),
        "ln_emb_g": o((H,)), "ln_emb_b": z((H,)),
        "wq": n(ks[3], (H, H)), "bq": z((H,)),
        "wk": n(ks[4], (H, H)), "bk": z((H,)),
        "wv": n(ks[5], (H, H)), "bv": z((H,)),
        "wo": n(ks[6], (H, H)), "bo": z((H,)),
        "ln1_g": o((H,)), "ln1_b": z((H,)),
        "w_ff1": n(ks[7], (H, 4 * H)), "b_ff1": z((4 * H,)),
        "w_ff2": n(ks[8], (4 * H, H)), "b_ff2": z((H,)),
        "ln2_g": o((H,)), "ln2_b": z((H,)),
    }


def init_params(key, vocab_size, max_seq, H, num_case):
    k_bert_m, k_bert_c, k_main, k_ctx, k_coref = jax.random.split(key, 5)
    n = lambda k, s: (0.02 * jax.random.normal(k, s)).astype(jnp.float32)
    z = lambda s: jnp.zeros(s, jnp.float32)

    def head_params(k, C):
        ks = jax.random.split(k, 3)
        return {
            # Linear weights stored transposed, (in, out); `out` head is bias-free.
            "w_prd_t": n(ks[0], (H, C * H)), "b_prd": z((C * H,)),
            "w_arg_t": n(ks[1], (H, C * H)), "b_arg": z((C * H,)),
            "w_out": n(ks[2], (H, 1)),
        }

    main_head = head_params(k_main, num_case)
    kc1, _ = jax.random.split(k_ctx)
    main_head["w_ctx_t"] = n(kc1, (H, H))     # l_context
    main_head["b_ctx"] = z((H,))
    return {
        "bert_main": bert_stub_params(k_bert_m, vocab_size, max_seq, H),
        "bert_coref": bert_stub_params(k_bert_c, vocab_size, max_seq, H),
        "main_head": main_head,
        "coref_head": head_params(k_coref, 1),   # BaselineModel(num_case=0, coreference=True)
    }


if __name__ == "__main__":
    B, S, H, VOCAB = 2, 8, 32, 100
    NUM_CASE = 4           # coreference=True: ng_token_mask / target carry NUM_CASE + 1 cases

    key = jax.random.PRNGKey(0)
    kp, k1, k2, k3 = jax.random.split(key, 4)
    params = init_params(kp, VOCAB, S, H, NUM_CASE)

    input_ids = jax.random.randint(k1, (B, S), 0, VOCAB, dtype=jnp.int32)
    attention_mask = jnp.concatenate(
        [jnp.ones((B, S - 2), jnp.int32), jnp.zeros((B, 2), jnp.int32)], axis=1)
    segment_ids = jnp.zeros((B, S), jnp.int32)
    ng_token_mask = jax.random.bernoulli(k2, 0.8, (B, S, NUM_CASE + 1, S))
    target = jax.random.bernoulli(k3, 0.1, (B, S, NUM_CASE + 1, S)).astype(jnp.float32)

    fwd = jax.jit(coreference_separated_forward)
    loss, output = fwd(params, input_ids, attention_mask, segment_ids,
                       ng_token_mask, target)
    jax.block_until_ready((loss, output))

    assert loss.shape == ()
    assert output.shape == (B, S, NUM_CASE + 1, S)
    print("KERNEL_OK")
</pallas_src>

<mosaic_0001>
module attributes {stable_mosaic.version = 11 : i64} {
  func.func @_pas_head_kernel(%arg0: i32, %arg1: i32, %arg2: i32, %arg3: memref<1x8x32xbf16, #tpu.memory_space<vmem>>, %arg4: memref<32x32xbf16, #tpu.memory_space<vmem>>, %arg5: memref<1x32xf32, #tpu.memory_space<vmem>>, %arg6: memref<32x32xbf16, #tpu.memory_space<vmem>>, %arg7: memref<1x32xf32, #tpu.memory_space<vmem>>, %arg8: memref<1x32xf32, #tpu.memory_space<vmem>>, %arg9: memref<1x8x8xbf16, #tpu.memory_space<vmem>>, %arg10: memref<1x8x8xf32, #tpu.memory_space<vmem>>, %arg11: memref<1x1x8x32xbf16, #tpu.memory_space<vmem>>, %arg12: memref<1x1x8x32xbf16, #tpu.memory_space<vmem>>, %arg13: memref<8x8x32xf32, #tpu.memory_space<vmem>>) attributes {dimension_semantics = [#tpu.dimension_semantics<parallel>, #tpu.dimension_semantics<parallel>, #tpu.dimension_semantics<arbitrary>], iteration_bounds = array<i64: 2, 1, 1>, scalar_prefetch = 0 : i64, scratch_operands = 3 : i64, tpu.core_type = #tpu.core_type<tc>, window_params = [{transform_indices = @transform_0, window_bounds = array<i64: 1, 8, 32>}, {pipeline_mode = #tpu.pipeline_mode<synchronous>, transform_indices = @transform_1, window_bounds = array<i64: 32, 32>}, {pipeline_mode = #tpu.pipeline_mode<synchronous>, transform_indices = @transform_2, window_bounds = array<i64: 1, 32>}, {pipeline_mode = #tpu.pipeline_mode<synchronous>, transform_indices = @transform_3, window_bounds = array<i64: 32, 32>}, {pipeline_mode = #tpu.pipeline_mode<synchronous>, transform_indices = @transform_4, window_bounds = array<i64: 1, 32>}, {pipeline_mode = #tpu.pipeline_mode<synchronous>, transform_indices = @transform_5, window_bounds = array<i64: 1, 32>}, {transform_indices = @transform_6, window_bounds = array<i64: 1, 8, 8>}, {transform_indices = @transform_7, window_bounds = array<i64: 1, 8, 8>}]} {
    %c0_i32 = arith.constant 0 : i32
    %0 = arith.cmpi eq, %arg2, %c0_i32 : i32
    %1 = arith.extui %0 : i1 to i32
    %c0_i32_0 = arith.constant 0 : i32
    %2 = arith.cmpi ne, %1, %c0_i32_0 : i32
    scf.if %2 {
      %c0_21 = arith.constant 0 : index
      %c0_22 = arith.constant 0 : index
      %c0_23 = arith.constant 0 : index
      %34 = vector.load %arg3[%c0_21, %c0_22, %c0_23] : memref<1x8x32xbf16, #tpu.memory_space<vmem>>, vector<1x8x32xbf16>
      %35 = vector.shape_cast %34 : vector<1x8x32xbf16> to vector<8x32xbf16>
      %c0_24 = arith.constant 0 : index
      %c0_25 = arith.constant 0 : index
      %36 = vector.load %arg4[%c0_24, %c0_25] : memref<32x32xbf16, #tpu.memory_space<vmem>>, vector<32x32xbf16>
      %cst_26 = arith.constant dense<0.000000e+00> : vector<8x32xf32>
      %37 = tpu.matmul %35, %36, %cst_26 {dimension_numbers = #tpu.dot_dimension_numbers<[1], [0], [0], [1], [0, 0, 1, 1], [], []>} : vector<8x32xbf16>, vector<32x32xbf16>, vector<8x32xf32> -> vector<8x32xf32>
      %c0_27 = arith.constant 0 : index
      %c0_28 = arith.constant 0 : index
      %38 = vector.load %arg5[%c0_27, %c0_28] : memref<1x32xf32, #tpu.memory_space<vmem>>, vector<1x32xf32>
      %39 = vector.shape_cast %38 : vector<1x32xf32> to vector<32xf32>
      %40 = vector.shape_cast %39 : vector<32xf32> to vector<1x32xf32>
      %41 = vector.broadcast %40 : vector<1x32xf32> to vector<8x32xf32>
      %42 = arith.addf %37, %41 : vector<8x32xf32>
      %c0_29 = arith.constant 0 : index
      %c0_30 = arith.constant 0 : index
      %43 = vector.load %arg6[%c0_29, %c0_30] : memref<32x32xbf16, #tpu.memory_space<vmem>>, vector<32x32xbf16>
      %cst_31 = arith.constant dense<0.000000e+00> : vector<8x32xf32>
      %44 = tpu.matmul %35, %43, %cst_31 {dimension_numbers = #tpu.dot_dimension_numbers<[1], [0], [0], [1], [0, 0, 1, 1], [], []>} : vector<8x32xbf16>, vector<32x32xbf16>, vector<8x32xf32> -> vector<8x32xf32>
      %c0_32 = arith.constant 0 : index
      %c0_33 = arith.constant 0 : index
      %45 = vector.load %arg7[%c0_32, %c0_33] : memref<1x32xf32, #tpu.memory_space<vmem>>, vector<1x32xf32>
      %46 = vector.shape_cast %45 : vector<1x32xf32> to vector<32xf32>
      %47 = vector.shape_cast %46 : vector<32xf32> to vector<1x32xf32>
      %48 = vector.broadcast %47 : vector<1x32xf32> to vector<8x32xf32>
      %49 = arith.addf %44, %48 : vector<8x32xf32>
      %50 = arith.truncf %42 : vector<8x32xf32> to vector<8x32xbf16>
      %c0_34 = arith.constant 0 : index
      %c0_35 = arith.constant 0 : index
      %c0_36 = arith.constant 0 : index
      %c0_37 = arith.constant 0 : index
      %51 = vector.load %arg11[%c0_34, %c0_35, %c0_36, %c0_37] : memref<1x1x8x32xbf16, #tpu.memory_space<vmem>>, vector<1x1x8x32xbf16>
      %52 = vector.shape_cast %51 : vector<1x1x8x32xbf16> to vector<8x32xbf16>
      %53 = vector.shape_cast %50 : vector<8x32xbf16> to vector<1x1x8x32xbf16>
      tpu.vector_store %arg11[%c0_34, %c0_35, %c0_36, %c0_37], %53 {strides = array<i32>} : memref<1x1x8x32xbf16, #tpu.memory_space<vmem>>, vector<1x1x8x32xbf16>,
      %54 = arith.truncf %49 : vector<8x32xf32> to vector<8x32xbf16>
      %c0_38 = arith.constant 0 : index
      %c0_39 = arith.constant 0 : index
      %c0_40 = arith.constant 0 : index
      %c0_41 = arith.constant 0 : index
      %55 = vector.load %arg12[%c0_38, %c0_39, %c0_40, %c0_41] : memref<1x1x8x32xbf16, #tpu.memory_space<vmem>>, vector<1x1x8x32xbf16>
      %56 = vector.shape_cast %55 : vector<1x1x8x32xbf16> to vector<8x32xbf16>
      %57 = vector.shape_cast %54 : vector<8x32xbf16> to vector<1x1x8x32xbf16>
      tpu.vector_store %arg12[%c0_38, %c0_39, %c0_40, %c0_41], %57 {strides = array<i32>} : memref<1x1x8x32xbf16, #tpu.memory_space<vmem>>, vector<1x1x8x32xbf16>,
    } else {
    }
    %c1_i32 = arith.constant 1 : i32
    %3 = arith.muli %arg1, %c1_i32 : i32
    %4 = arith.addi %3, %arg2 : i32
    %c8_i32 = arith.constant 8 : i32
    %5 = arith.muli %4, %c8_i32 : i32
    %6 = tpu.assume_multiple %5, 8 : i32
    %c0 = arith.constant 0 : index
    %c0_1 = arith.constant 0 : index
    %7 = arith.index_cast %6 : i32 to index
    %c0_2 = arith.constant 0 : index
    %8 = vector.load %arg11[%c0, %c0_1, %7, %c0_2] : memref<1x1x8x32xbf16, #tpu.memory_space<vmem>>, vector<1x1x8x32xbf16>
    %9 = vector.shape_cast %8 : vector<1x1x8x32xbf16> to vector<8x32xbf16>
    %c0_3 = arith.constant 0 : index
    %c0_4 = arith.constant 0 : index
    %c0_5 = arith.constant 0 : index
    %c0_6 = arith.constant 0 : index
    %10 = vector.load %arg12[%c0_3, %c0_4, %c0_5, %c0_6] : memref<1x1x8x32xbf16, #tpu.memory_space<vmem>>, vector<1x1x8x32xbf16>
    %11 = vector.shape_cast %10 : vector<1x1x8x32xbf16> to vector<8x32xbf16>
    %c0_7 = arith.constant 0 : index
    %c0_8 = arith.constant 0 : index
    %12 = vector.load %arg8[%c0_7, %c0_8] : memref<1x32xf32, #tpu.memory_space<vmem>>, vector<1x32xf32>
    %13 = vector.shape_cast %12 : vector<1x32xf32> to vector<32xf32>
    %14 = vector.shape_cast %9 : vector<8x32xbf16> to vector<8x1x32xbf16>
    %15 = vector.shape_cast %11 : vector<8x32xbf16> to vector<1x8x32xbf16>
    %16 = vector.broadcast %14 : vector<8x1x32xbf16> to vector<8x8x32xbf16>
    %17 = vector.broadcast %15 : vector<1x8x32xbf16> to vector<8x8x32xbf16>
    %18 = arith.addf %16, %17 : vector<8x8x32xbf16>
    %19 = math.tanh %18 : vector<8x8x32xbf16>
    %20 = arith.extf %19 : vector<8x8x32xbf16> to vector<8x8x32xf32>
    %21 = vector.shape_cast %13 : vector<32xf32> to vector<1x1x32xf32>
    %22 = vector.broadcast %21 : vector<1x1x32xf32> to vector<8x8x32xf32>
    %23 = arith.mulf %22, %20 : vector<8x8x32xf32>
    %c0_9 = arith.constant 0 : index
    %c0_10 = arith.constant 0 : index
    %c0_11 = arith.constant 0 : index
    %24 = vector.load %arg13[%c0_9, %c0_10, %c0_11] : memref<8x8x32xf32, #tpu.memory_space<vmem>>, vector<8x8x32xf32>
    tpu.vector_store %arg13[%c0_9, %c0_10, %c0_11], %23 {strides = array<i32>} : memref<8x8x32xf32, #tpu.memory_space<vmem>>, vector<8x8x32xf32>,
    %c0_12 = arith.constant 0 : index
    %c0_13 = arith.constant 0 : index
    %c0_14 = arith.constant 0 : index
    %25 = vector.load %arg13[%c0_12, %c0_13, %c0_14] : memref<8x8x32xf32, #tpu.memory_space<vmem>>, vector<8x8x32xf32>
    %cst = arith.constant dense<0.000000e+00> : vector<8x8xf32>
    %26 = vector.multi_reduction <add>, %25, %cst [2] : vector<8x8x32xf32> to vector<8x8xf32>
    %c0_15 = arith.constant 0 : index
    %c0_16 = arith.constant 0 : index
    %c0_17 = arith.constant 0 : index
    %27 = vector.load %arg9[%c0_15, %c0_16, %c0_17] : memref<1x8x8xbf16, #tpu.memory_space<vmem>>, vector<1x8x8xbf16>
    %28 = vector.shape_cast %27 : vector<1x8x8xbf16> to vector<8x8xbf16>
    %29 = arith.extf %28 : vector<8x8xbf16> to vector<8x8xf32>
    %30 = arith.addf %26, %29 : vector<8x8xf32>
    %c0_18 = arith.constant 0 : index
    %c0_19 = arith.constant 0 : index
    %c0_20 = arith.constant 0 : index
    %31 = vector.load %arg10[%c0_18, %c0_19, %c0_20] : memref<1x8x8xf32, #tpu.memory_space<vmem>>, vector<1x8x8xf32>
    %32 = vector.shape_cast %31 : vector<1x8x8xf32> to vector<8x8xf32>
    %33 = vector.shape_cast %30 : vector<8x8xf32> to vector<1x8x8xf32>
    tpu.vector_store %arg10[%c0_18, %c0_19, %c0_20], %33 {strides = array<i32>} : memref<1x8x8xf32, #tpu.memory_space<vmem>>, vector<1x8x8xf32>,
    return
  }
  func.func @transform_0(%arg0: i32, %arg1: i32, %arg2: i32) -> (i32, i32, i32) {
    %c0_i32 = arith.constant 0 : i32
    %c0_i32_0 = arith.constant 0 : i32
    %c0_i32_1 = arith.constant 0 : i32
    return %arg0, %c0_i32, %c0_i32_0 : i32, i32, i32
  }
  func.func @transform_1(%arg0: i32, %arg1: i32, %arg2: i32) -> (i32, i32) {
    %c0_i32 = arith.constant 0 : i32
    %c0_i32_0 = arith.constant 0 : i32
    %c0_i32_1 = arith.constant 0 : i32
    return %c0_i32, %c0_i32_0 : i32, i32
  }
  func.func @transform_2(%arg0: i32, %arg1: i32, %arg2: i32) -> (i32, i32) {
    %c0_i32 = arith.constant 0 : i32
    %c0_i32_0 = arith.constant 0 : i32
    %c0_i32_1 = arith.constant 0 : i32
    return %c0_i32, %c0_i32_0 : i32, i32
  }
  func.func @transform_3(%arg0: i32, %arg1: i32, %arg2: i32) -> (i32, i32) {
    %c0_i32 = arith.constant 0 : i32
    %c0_i32_0 = arith.constant 0 : i32
    %c0_i32_1 = arith.constant 0 : i32
    return %c0_i32, %c0_i32_0 : i32, i32
  }
  func.func @transform_4(%arg0: i32, %arg1: i32, %arg2: i32) -> (i32, i32) {
    %c0_i32 = arith.constant 0 : i32
    %c0_i32_0 = arith.constant 0 : i32
    %c0_i32_1 = arith.constant 0 : i32
    return %c0_i32, %c0_i32_0 : i32, i32
  }
  func.func @transform_5(%arg0: i32, %arg1: i32, %arg2: i32) -> (i32, i32) {
    %c0_i32 = arith.constant 0 : i32
    %c0_i32_0 = arith.constant 0 : i32
    %c0_i32_1 = arith.constant 0 : i32
    return %c0_i32, %c0_i32_0 : i32, i32
  }
  func.func @transform_6(%arg0: i32, %arg1: i32, %arg2: i32) -> (i32, i32, i32) {
    %c1_i32 = arith.constant 1 : i32
    %0 = arith.muli %arg1, %c1_i32 : i32
    %1 = arith.addi %0, %arg2 : i32
    %c0_i32 = arith.constant 0 : i32
    %c0_i32_0 = arith.constant 0 : i32
    return %arg0, %1, %c0_i32 : i32, i32, i32
  }
  func.func @transform_7(%arg0: i32, %arg1: i32, %arg2: i32) -> (i32, i32, i32) {
    %c1_i32 = arith.constant 1 : i32
    %0 = arith.muli %arg1, %c1_i32 : i32
    %1 = arith.addi %0, %arg2 : i32
    %c0_i32 = arith.constant 0 : i32
    %c0_i32_0 = arith.constant 0 : i32
    return %arg0, %1, %c0_i32 : i32, i32, i32
  }
}

module attributes {stable_mosaic.version = 11 : i64} {
  func.func @_pas_head_kernel(%arg0: i32, %arg1: i32, %arg2: i32, %arg3: memref<1x8x32xbf16, #tpu.memory_space<vmem>>, %arg4: memref<1x8x32xbf16, #tpu.memory_space<vmem>>, %arg5: memref<32x128xbf16, #tpu.memory_space<vmem>>, %arg6: memref<1x128xf32, #tpu.memory_space<vmem>>, %arg7: memref<32x128xbf16, #tpu.memory_space<vmem>>, %arg8: memref<1x128xf32, #tpu.memory_space<vmem>>, %arg9: memref<1x32xf32, #tpu.memory_space<vmem>>, %arg10: memref<1x8x32xbf16, #tpu.memory_space<vmem>>, %arg11: memref<1x8x32xf32, #tpu.memory_space<vmem>>, %arg12: memref<4x1x8x32xbf16, #tpu.memory_space<vmem>>, %arg13: memref<4x1x8x32xbf16, #tpu.memory_space<vmem>>, %arg14: memref<8x8x32xf32, #tpu.memory_space<vmem>>) attributes {dimension_semantics = [#tpu.dimension_semantics<parallel>, #tpu.dimension_semantics<parallel>, #tpu.dimension_semantics<arbitrary>], iteration_bounds = array<i64: 2, 1, 1>, scalar_prefetch = 0 : i64, scratch_operands = 3 : i64, tpu.core_type = #tpu.core_type<tc>, window_params = [{transform_indices = @transform_0, window_bounds = array<i64: 1, 8, 32>}, {transform_indices = @transform_1, window_bounds = array<i64: 1, 8, 32>}, {pipeline_mode = #tpu.pipeline_mode<synchronous>, transform_indices = @transform_2, window_bounds = array<i64: 32, 128>}, {pipeline_mode = #tpu.pipeline_mode<synchronous>, transform_indices = @transform_3, window_bounds = array<i64: 1, 128>}, {pipeline_mode = #tpu.pipeline_mode<synchronous>, transform_indices = @transform_4, window_bounds = array<i64: 32, 128>}, {pipeline_mode = #tpu.pipeline_mode<synchronous>, transform_indices = @transform_5, window_bounds = array<i64: 1, 128>}, {pipeline_mode = #tpu.pipeline_mode<synchronous>, transform_indices = @transform_6, window_bounds = array<i64: 1, 32>}, {transform_indices = @transform_7, window_bounds = array<i64: 1, 8, 32>}, {transform_indices = @transform_8, window_bounds = array<i64: 1, 8, 32>}]} {
    %c0_i32 = arith.constant 0 : i32
    %0 = arith.cmpi eq, %arg2, %c0_i32 : i32
    %1 = arith.extui %0 : i1 to i32
    %c0_i32_0 = arith.constant 0 : i32
    %2 = arith.cmpi ne, %1, %c0_i32_0 : i32
    scf.if %2 {
      %c0_81 = arith.constant 0 : index
      %c0_82 = arith.constant 0 : index
      %c0_83 = arith.constant 0 : index
      %115 = vector.load %arg3[%c0_81, %c0_82, %c0_83] : memref<1x8x32xbf16, #tpu.memory_space<vmem>>, vector<1x8x32xbf16>
      %116 = vector.shape_cast %115 : vector<1x8x32xbf16> to vector<8x32xbf16>
      %c0_84 = arith.constant 0 : index
      %c0_85 = arith.constant 0 : index
      %c0_86 = arith.constant 0 : index
      %117 = vector.load %arg4[%c0_84, %c0_85, %c0_86] : memref<1x8x32xbf16, #tpu.memory_space<vmem>>, vector<1x8x32xbf16>
      %118 = vector.shape_cast %117 : vector<1x8x32xbf16> to vector<8x32xbf16>
      %119 = arith.extf %118 : vector<8x32xbf16> to vector<8x32xf32>
      %c0_87 = arith.constant 0 : index
      %c0_88 = arith.constant 0 : index
      %120 = vector.load %arg5[%c0_87, %c0_88] : memref<32x128xbf16, #tpu.memory_space<vmem>>, vector<32x32xbf16>
      %cst_89 = arith.constant dense<0.000000e+00> : vector<8x32xf32>
      %121 = tpu.matmul %116, %120, %cst_89 {dimension_numbers = #tpu.dot_dimension_numbers<[1], [0], [0], [1], [0, 0, 1, 1], [], []>} : vector<8x32xbf16>, vector<32x32xbf16>, vector<8x32xf32> -> vector<8x32xf32>
      %c0_90 = arith.constant 0 : index
      %c0_91 = arith.constant 0 : index
      %122 = vector.load %arg6[%c0_90, %c0_91] : memref<1x128xf32, #tpu.memory_space<vmem>>, vector<1x32xf32>
      %123 = vector.shape_cast %122 : vector<1x32xf32> to vector<32xf32>
      %124 = vector.shape_cast %123 : vector<32xf32> to vector<1x32xf32>
      %125 = vector.broadcast %124 : vector<1x32xf32> to vector<8x32xf32>
      %126 = arith.addf %121, %125 : vector<8x32xf32>
      %c0_92 = arith.constant 0 : index
      %c0_93 = arith.constant 0 : index
      %127 = vector.load %arg7[%c0_92, %c0_93] : memref<32x128xbf16, #tpu.memory_space<vmem>>, vector<32x32xbf16>
      %cst_94 = arith.constant dense<0.000000e+00> : vector<8x32xf32>
      %128 = tpu.matmul %116, %127, %cst_94 {dimension_numbers = #tpu.dot_dimension_numbers<[1], [0], [0], [1], [0, 0, 1, 1], [], []>} : vector<8x32xbf16>, vector<32x32xbf16>, vector<8x32xf32> -> vector<8x32xf32>
      %c0_95 = arith.constant 0 : index
      %c0_96 = arith.constant 0 : index
      %129 = vector.load %arg8[%c0_95, %c0_96] : memref<1x128xf32, #tpu.memory_space<vmem>>, vector<1x32xf32>
      %130 = vector.shape_cast %129 : vector<1x32xf32> to vector<32xf32>
      %131 = vector.shape_cast %130 : vector<32xf32> to vector<1x32xf32>
      %132 = vector.broadcast %131 : vector<1x32xf32> to vector<8x32xf32>
      %133 = arith.addf %128, %132 : vector<8x32xf32>
      %134 = arith.addf %133, %119 : vector<8x32xf32>
      %135 = arith.truncf %126 : vector<8x32xf32> to vector<8x32xbf16>
      %c0_97 = arith.constant 0 : index
      %c0_98 = arith.constant 0 : index
      %c0_99 = arith.constant 0 : index
      %c0_100 = arith.constant 0 : index
      %136 = vector.load %arg12[%c0_97, %c0_98, %c0_99, %c0_100] : memref<4x1x8x32xbf16, #tpu.memory_space<vmem>>, vector<1x1x8x32xbf16>
      %137 = vector.shape_cast %136 : vector<1x1x8x32xbf16> to vector<8x32xbf16>
      %138 = vector.shape_cast %135 : vector<8x32xbf16> to vector<1x1x8x32xbf16>
      tpu.vector_store %arg12[%c0_97, %c0_98, %c0_99, %c0_100], %138 {strides = array<i32>} : memref<4x1x8x32xbf16, #tpu.memory_space<vmem>>, vector<1x1x8x32xbf16>,
      %139 = arith.truncf %134 : vector<8x32xf32> to vector<8x32xbf16>
      %c0_101 = arith.constant 0 : index
      %c0_102 = arith.constant 0 : index
      %c0_103 = arith.constant 0 : index
      %c0_104 = arith.constant 0 : index
      %140 = vector.load %arg13[%c0_101, %c0_102, %c0_103, %c0_104] : memref<4x1x8x32xbf16, #tpu.memory_space<vmem>>, vector<1x1x8x32xbf16>
      %141 = vector.shape_cast %140 : vector<1x1x8x32xbf16> to vector<8x32xbf16>
      %142 = vector.shape_cast %139 : vector<8x32xbf16> to vector<1x1x8x32xbf16>
      tpu.vector_store %arg13[%c0_101, %c0_102, %c0_103, %c0_104], %142 {strides = array<i32>} : memref<4x1x8x32xbf16, #tpu.memory_space<vmem>>, vector<1x1x8x32xbf16>,
      %c0_105 = arith.constant 0 : index
      %c32 = arith.constant 32 : index
      %143 = vector.load %arg5[%c0_105, %c32] : memref<32x128xbf16, #tpu.memory_space<vmem>>, vector<32x32xbf16>
      %cst_106 = arith.constant dense<0.000000e+00> : vector<8x32xf32>
      %144 = tpu.matmul %116, %143, %cst_106 {dimension_numbers = #tpu.dot_dimension_numbers<[1], [0], [0], [1], [0, 0, 1, 1], [], []>} : vector<8x32xbf16>, vector<32x32xbf16>, vector<8x32xf32> -> vector<8x32xf32>
      %c0_107 = arith.constant 0 : index
      %c32_108 = arith.constant 32 : index
      %145 = vector.load %arg6[%c0_107, %c32_108] : memref<1x128xf32, #tpu.memory_space<vmem>>, vector<1x32xf32>
      %146 = vector.shape_cast %145 : vector<1x32xf32> to vector<32xf32>
      %147 = vector.shape_cast %146 : vector<32xf32> to vector<1x32xf32>
      %148 = vector.broadcast %147 : vector<1x32xf32> to vector<8x32xf32>
      %149 = arith.addf %144, %148 : vector<8x32xf32>
      %c0_109 = arith.constant 0 : index
      %c32_110 = arith.constant 32 : index
      %150 = vector.load %arg7[%c0_109, %c32_110] : memref<32x128xbf16, #tpu.memory_space<vmem>>, vector<32x32xbf16>
      %cst_111 = arith.constant dense<0.000000e+00> : vector<8x32xf32>
      %151 = tpu.matmul %116, %150, %cst_111 {dimension_numbers = #tpu.dot_dimension_numbers<[1], [0], [0], [1], [0, 0, 1, 1], [], []>} : vector<8x32xbf16>, vector<32x32xbf16>, vector<8x32xf32> -> vector<8x32xf32>
      %c0_112 = arith.constant 0 : index
      %c32_113 = arith.constant 32 : index
      %152 = vector.load %arg8[%c0_112, %c32_113] : memref<1x128xf32, #tpu.memory_space<vmem>>, vector<1x32xf32>
      %153 = vector.shape_cast %152 : vector<1x32xf32> to vector<32xf32>
      %154 = vector.shape_cast %153 : vector<32xf32> to vector<1x32xf32>
      %155 = vector.broadcast %154 : vector<1x32xf32> to vector<8x32xf32>
      %156 = arith.addf %151, %155 : vector<8x32xf32>
      %157 = arith.addf %156, %119 : vector<8x32xf32>
      %158 = arith.truncf %149 : vector<8x32xf32> to vector<8x32xbf16>
      %c1_114 = arith.constant 1 : index
      %c0_115 = arith.constant 0 : index
      %c0_116 = arith.constant 0 : index
      %c0_117 = arith.constant 0 : index
      %159 = vector.load %arg12[%c1_114, %c0_115, %c0_116, %c0_117] : memref<4x1x8x32xbf16, #tpu.memory_space<vmem>>, vector<1x1x8x32xbf16>
      %160 = vector.shape_cast %159 : vector<1x1x8x32xbf16> to vector<8x32xbf16>
      %161 = vector.shape_cast %158 : vector<8x32xbf16> to vector<1x1x8x32xbf16>
      tpu.vector_store %arg12[%c1_114, %c0_115, %c0_116, %c0_117], %161 {strides = array<i32>} : memref<4x1x8x32xbf16, #tpu.memory_space<vmem>>, vector<1x1x8x32xbf16>,
      %162 = arith.truncf %157 : vector<8x32xf32> to vector<8x32xbf16>
      %c1_118 = arith.constant 1 : index
      %c0_119 = arith.constant 0 : index
      %c0_120 = arith.constant 0 : index
      %c0_121 = arith.constant 0 : index
      %163 = vector.load %arg13[%c1_118, %c0_119, %c0_120, %c0_121] : memref<4x1x8x32xbf16, #tpu.memory_space<vmem>>, vector<1x1x8x32xbf16>
      %164 = vector.shape_cast %163 : vector<1x1x8x32xbf16> to vector<8x32xbf16>
      %165 = vector.shape_cast %162 : vector<8x32xbf16> to vector<1x1x8x32xbf16>
      tpu.vector_store %arg13[%c1_118, %c0_119, %c0_120, %c0_121], %165 {strides = array<i32>} : memref<4x1x8x32xbf16, #tpu.memory_space<vmem>>, vector<1x1x8x32xbf16>,
      %c0_122 = arith.constant 0 : index
      %c64 = arith.constant 64 : index
      %166 = vector.load %arg5[%c0_122, %c64] : memref<32x128xbf16, #tpu.memory_space<vmem>>, vector<32x32xbf16>
      %cst_123 = arith.constant dense<0.000000e+00> : vector<8x32xf32>
      %167 = tpu.matmul %116, %166, %cst_123 {dimension_numbers = #tpu.dot_dimension_numbers<[1], [0], [0], [1], [0, 0, 1, 1], [], []>} : vector<8x32xbf16>, vector<32x32xbf16>, vector<8x32xf32> -> vector<8x32xf32>
      %c0_124 = arith.constant 0 : index
      %c64_125 = arith.constant 64 : index
      %168 = vector.load %arg6[%c0_124, %c64_125] : memref<1x128xf32, #tpu.memory_space<vmem>>, vector<1x32xf32>
      %169 = vector.shape_cast %168 : vector<1x32xf32> to vector<32xf32>
      %170 = vector.shape_cast %169 : vector<32xf32> to vector<1x32xf32>
      %171 = vector.broadcast %170 : vector<1x32xf32> to vector<8x32xf32>
      %172 = arith.addf %167, %171 : vector<8x32xf32>
      %c0_126 = arith.constant 0 : index
      %c64_127 = arith.constant 64 : index
      %173 = vector.load %arg7[%c0_126, %c64_127] : memref<32x128xbf16, #tpu.memory_space<vmem>>, vector<32x32xbf16>
      %cst_128 = arith.constant dense<0.000000e+00> : vector<8x32xf32>
      %174 = tpu.matmul %116, %173, %cst_128 {dimension_numbers = #tpu.dot_dimension_numbers<[1], [0], [0], [1], [0, 0, 1, 1], [], []>} : vector<8x32xbf16>, vector<32x32xbf16>, vector<8x32xf32> -> vector<8x32xf32>
      %c0_129 = arith.constant 0 : index
      %c64_130 = arith.constant 64 : index
      %175 = vector.load %arg8[%c0_129, %c64_130] : memref<1x128xf32, #tpu.memory_space<vmem>>, vector<1x32xf32>
      %176 = vector.shape_cast %175 : vector<1x32xf32> to vector<32xf32>
      %177 = vector.shape_cast %176 : vector<32xf32> to vector<1x32xf32>
      %178 = vector.broadcast %177 : vector<1x32xf32> to vector<8x32xf32>
      %179 = arith.addf %174, %178 : vector<8x32xf32>
      %180 = arith.addf %179, %119 : vector<8x32xf32>
      %181 = arith.truncf %172 : vector<8x32xf32> to vector<8x32xbf16>
      %c2_131 = arith.constant 2 : index
      %c0_132 = arith.constant 0 : index
      %c0_133 = arith.constant 0 : index
      %c0_134 = arith.constant 0 : index
      %182 = vector.load %arg12[%c2_131, %c0_132, %c0_133, %c0_134] : memref<4x1x8x32xbf16, #tpu.memory_space<vmem>>, vector<1x1x8x32xbf16>
      %183 = vector.shape_cast %182 : vector<1x1x8x32xbf16> to vector<8x32xbf16>
      %184 = vector.shape_cast %181 : vector<8x32xbf16> to vector<1x1x8x32xbf16>
      tpu.vector_store %arg12[%c2_131, %c0_132, %c0_133, %c0_134], %184 {strides = array<i32>} : memref<4x1x8x32xbf16, #tpu.memory_space<vmem>>, vector<1x1x8x32xbf16>,
      %185 = arith.truncf %180 : vector<8x32xf32> to vector<8x32xbf16>
      %c2_135 = arith.constant 2 : index
      %c0_136 = arith.constant 0 : index
      %c0_137 = arith.constant 0 : index
      %c0_138 = arith.constant 0 : index
      %186 = vector.load %arg13[%c2_135, %c0_136, %c0_137, %c0_138] : memref<4x1x8x32xbf16, #tpu.memory_space<vmem>>, vector<1x1x8x32xbf16>
      %187 = vector.shape_cast %186 : vector<1x1x8x32xbf16> to vector<8x32xbf16>
      %188 = vector.shape_cast %185 : vector<8x32xbf16> to vector<1x1x8x32xbf16>
      tpu.vector_store %arg13[%c2_135, %c0_136, %c0_137, %c0_138], %188 {strides = array<i32>} : memref<4x1x8x32xbf16, #tpu.memory_space<vmem>>, vector<1x1x8x32xbf16>,
      %c0_139 = arith.constant 0 : index
      %c96 = arith.constant 96 : index
      %189 = vector.load %arg5[%c0_139, %c96] : memref<32x128xbf16, #tpu.memory_space<vmem>>, vector<32x32xbf16>
      %cst_140 = arith.constant dense<0.000000e+00> : vector<8x32xf32>
      %190 = tpu.matmul %116, %189, %cst_140 {dimension_numbers = #tpu.dot_dimension_numbers<[1], [0], [0], [1], [0, 0, 1, 1], [], []>} : vector<8x32xbf16>, vector<32x32xbf16>, vector<8x32xf32> -> vector<8x32xf32>
      %c0_141 = arith.constant 0 : index
      %c96_142 = arith.constant 96 : index
      %191 = vector.load %arg6[%c0_141, %c96_142] : memref<1x128xf32, #tpu.memory_space<vmem>>, vector<1x32xf32>
      %192 = vector.shape_cast %191 : vector<1x32xf32> to vector<32xf32>
      %193 = vector.shape_cast %192 : vector<32xf32> to vector<1x32xf32>
      %194 = vector.broadcast %193 : vector<1x32xf32> to vector<8x32xf32>
      %195 = arith.addf %190, %194 : vector<8x32xf32>
      %c0_143 = arith.constant 0 : index
      %c96_144 = arith.constant 96 : index
      %196 = vector.load %arg7[%c0_143, %c96_144] : memref<32x128xbf16, #tpu.memory_space<vmem>>, vector<32x32xbf16>
      %cst_145 = arith.constant dense<0.000000e+00> : vector<8x32xf32>
      %197 = tpu.matmul %116, %196, %cst_145 {dimension_numbers = #tpu.dot_dimension_numbers<[1], [0], [0], [1], [0, 0, 1, 1], [], []>} : vector<8x32xbf16>, vector<32x32xbf16>, vector<8x32xf32> -> vector<8x32xf32>
      %c0_146 = arith.constant 0 : index
      %c96_147 = arith.constant 96 : index
      %198 = vector.load %arg8[%c0_146, %c96_147] : memref<1x128xf32, #tpu.memory_space<vmem>>, vector<1x32xf32>
      %199 = vector.shape_cast %198 : vector<1x32xf32> to vector<32xf32>
      %200 = vector.shape_cast %199 : vector<32xf32> to vector<1x32xf32>
      %201 = vector.broadcast %200 : vector<1x32xf32> to vector<8x32xf32>
      %202 = arith.addf %197, %201 : vector<8x32xf32>
      %203 = arith.addf %202, %119 : vector<8x32xf32>
      %204 = arith.truncf %195 : vector<8x32xf32> to vector<8x32xbf16>
      %c3_148 = arith.constant 3 : index
      %c0_149 = arith.constant 0 : index
      %c0_150 = arith.constant 0 : index
      %c0_151 = arith.constant 0 : index
      %205 = vector.load %arg12[%c3_148, %c0_149, %c0_150, %c0_151] : memref<4x1x8x32xbf16, #tpu.memory_space<vmem>>, vector<1x1x8x32xbf16>
      %206 = vector.shape_cast %205 : vector<1x1x8x32xbf16> to vector<8x32xbf16>
      %207 = vector.shape_cast %204 : vector<8x32xbf16> to vector<1x1x8x32xbf16>
      tpu.vector_store %arg12[%c3_148, %c0_149, %c0_150, %c0_151], %207 {strides = array<i32>} : memref<4x1x8x32xbf16, #tpu.memory_space<vmem>>, vector<1x1x8x32xbf16>,
      %208 = arith.truncf %203 : vector<8x32xf32> to vector<8x32xbf16>
      %c3_152 = arith.constant 3 : index
      %c0_153 = arith.constant 0 : index
      %c0_154 = arith.constant 0 : index
      %c0_155 = arith.constant 0 : index
      %209 = vector.load %arg13[%c3_152, %c0_153, %c0_154, %c0_155] : memref<4x1x8x32xbf16, #tpu.memory_space<vmem>>, vector<1x1x8x32xbf16>
      %210 = vector.shape_cast %209 : vector<1x1x8x32xbf16> to vector<8x32xbf16>
      %211 = vector.shape_cast %208 : vector<8x32xbf16> to vector<1x1x8x32xbf16>
      tpu.vector_store %arg13[%c3_152, %c0_153, %c0_154, %c0_155], %211 {strides = array<i32>} : memref<4x1x8x32xbf16, #tpu.memory_space<vmem>>, vector<1x1x8x32xbf16>,
    } else {
    }
    %c1_i32 = arith.constant 1 : i32
    %3 = arith.muli %arg1, %c1_i32 : i32
    %4 = arith.addi %3, %arg2 : i32
    %c8_i32 = arith.constant 8 : i32
    %5 = arith.muli %4, %c8_i32 : i32
    %6 = tpu.assume_multiple %5, 8 : i32
    %c0 = arith.constant 0 : index
    %c0_1 = arith.constant 0 : index
    %7 = arith.index_cast %6 : i32 to index
    %c0_2 = arith.constant 0 : index
    %8 = vector.load %arg12[%c0, %c0_1, %7, %c0_2] : memref<4x1x8x32xbf16, #tpu.memory_space<vmem>>, vector<1x1x8x32xbf16>
    %9 = vector.shape_cast %8 : vector<1x1x8x32xbf16> to vector<8x32xbf16>
    %c0_3 = arith.constant 0 : index
    %c0_4 = arith.constant 0 : index
    %c0_5 = arith.constant 0 : index
    %c0_6 = arith.constant 0 : index
    %10 = vector.load %arg13[%c0_3, %c0_4, %c0_5, %c0_6] : memref<4x1x8x32xbf16, #tpu.memory_space<vmem>>, vector<1x1x8x32xbf16>
    %11 = vector.shape_cast %10 : vector<1x1x8x32xbf16> to vector<8x32xbf16>
    %c0_7 = arith.constant 0 : index
    %c0_8 = arith.constant 0 : index
    %12 = vector.load %arg9[%c0_7, %c0_8] : memref<1x32xf32, #tpu.memory_space<vmem>>, vector<1x32xf32>
    %13 = vector.shape_cast %12 : vector<1x32xf32> to vector<32xf32>
    %14 = vector.shape_cast %9 : vector<8x32xbf16> to vector<8x1x32xbf16>
    %15 = vector.shape_cast %11 : vector<8x32xbf16> to vector<1x8x32xbf16>
    %16 = vector.broadcast %14 : vector<8x1x32xbf16> to vector<8x8x32xbf16>
    %17 = vector.broadcast %15 : vector<1x8x32xbf16> to vector<8x8x32xbf16>
    %18 = arith.addf %16, %17 : vector<8x8x32xbf16>
    %19 = math.tanh %18 : vector<8x8x32xbf16>
    %20 = arith.extf %19 : vector<8x8x32xbf16> to vector<8x8x32xf32>
    %21 = vector.shape_cast %13 : vector<32xf32> to vector<1x1x32xf32>
    %22 = vector.broadcast %21 : vector<1x1x32xf32> to vector<8x8x32xf32>
    %23 = arith.mulf %22, %20 : vector<8x8x32xf32>
    %c0_9 = arith.constant 0 : index
    %c0_10 = arith.constant 0 : index
    %c0_11 = arith.constant 0 : index
    %24 = vector.load %arg14[%c0_9, %c0_10, %c0_11] : memref<8x8x32xf32, #tpu.memory_space<vmem>>, vector<8x8x32xf32>
    tpu.vector_store %arg14[%c0_9, %c0_10, %c0_11], %23 {strides = array<i32>} : memref<8x8x32xf32, #tpu.memory_space<vmem>>, vector<8x8x32xf32>,
    %c0_12 = arith.constant 0 : index
    %c0_13 = arith.constant 0 : index
    %c0_14 = arith.constant 0 : index
    %25 = vector.load %arg14[%c0_12, %c0_13, %c0_14] : memref<8x8x32xf32, #tpu.memory_space<vmem>>, vector<8x8x32xf32>
    %cst = arith.constant dense<0.000000e+00> : vector<8x8xf32>
    %26 = vector.multi_reduction <add>, %25, %cst [2] : vector<8x8x32xf32> to vector<8x8xf32>
    %c0_15 = arith.constant 0 : index
    %c0_16 = arith.constant 0 : index
    %c0_17 = arith.constant 0 : index
    %27 = vector.load %arg10[%c0_15, %c0_16, %c0_17] : memref<1x8x32xbf16, #tpu.memory_space<vmem>>, vector<1x8x8xbf16>
    %28 = vector.shape_cast %27 : vector<1x8x8xbf16> to vector<8x8xbf16>
    %29 = arith.extf %28 : vector<8x8xbf16> to vector<8x8xf32>
    %30 = arith.addf %26, %29 : vector<8x8xf32>
    %c0_18 = arith.constant 0 : index
    %c0_19 = arith.constant 0 : index
    %c0_20 = arith.constant 0 : index
    %31 = vector.load %arg11[%c0_18, %c0_19, %c0_20] : memref<1x8x32xf32, #tpu.memory_space<vmem>>, vector<1x8x8xf32>
    %32 = vector.shape_cast %31 : vector<1x8x8xf32> to vector<8x8xf32>
    %33 = vector.shape_cast %30 : vector<8x8xf32> to vector<1x8x8xf32>
    tpu.vector_store %arg11[%c0_18, %c0_19, %c0_20], %33 {strides = array<i32>} : memref<1x8x32xf32, #tpu.memory_space<vmem>>, vector<1x8x8xf32>,
    %c1 = arith.constant 1 : index
    %c0_21 = arith.constant 0 : index
    %34 = arith.index_cast %6 : i32 to index
    %c0_22 = arith.constant 0 : index
    %35 = vector.load %arg12[%c1, %c0_21, %34, %c0_22] : memref<4x1x8x32xbf16, #tpu.memory_space<vmem>>, vector<1x1x8x32xbf16>
    %36 = vector.shape_cast %35 : vector<1x1x8x32xbf16> to vector<8x32xbf16>
    %c1_23 = arith.constant 1 : index
    %c0_24 = arith.constant 0 : index
    %c0_25 = arith.constant 0 : index
    %c0_26 = arith.constant 0 : index
    %37 = vector.load %arg13[%c1_23, %c0_24, %c0_25, %c0_26] : memref<4x1x8x32xbf16, #tpu.memory_space<vmem>>, vector<1x1x8x32xbf16>
    %38 = vector.shape_cast %37 : vector<1x1x8x32xbf16> to vector<8x32xbf16>
    %c0_27 = arith.constant 0 : index
    %c0_28 = arith.constant 0 : index
    %39 = vector.load %arg9[%c0_27, %c0_28] : memref<1x32xf32, #tpu.memory_space<vmem>>, vector<1x32xf32>
    %40 = vector.shape_cast %39 : vector<1x32xf32> to vector<32xf32>
    %41 = vector.shape_cast %36 : vector<8x32xbf16> to vector<8x1x32xbf16>
    %42 = vector.shape_cast %38 : vector<8x32xbf16> to vector<1x8x32xbf16>
    %43 = vector.broadcast %41 : vector<8x1x32xbf16> to vector<8x8x32xbf16>
    %44 = vector.broadcast %42 : vector<1x8x32xbf16> to vector<8x8x32xbf16>
    %45 = arith.addf %43, %44 : vector<8x8x32xbf16>
    %46 = math.tanh %45 : vector<8x8x32xbf16>
    %47 = arith.extf %46 : vector<8x8x32xbf16> to vector<8x8x32xf32>
    %48 = vector.shape_cast %40 : vector<32xf32> to vector<1x1x32xf32>
    %49 = vector.broadcast %48 : vector<1x1x32xf32> to vector<8x8x32xf32>
    %50 = arith.mulf %49, %47 : vector<8x8x32xf32>
    %c0_29 = arith.constant 0 : index
    %c0_30 = arith.constant 0 : index
    %c0_31 = arith.constant 0 : index
    %51 = vector.load %arg14[%c0_29, %c0_30, %c0_31] : memref<8x8x32xf32, #tpu.memory_space<vmem>>, vector<8x8x32xf32>
    tpu.vector_store %arg14[%c0_29, %c0_30, %c0_31], %50 {strides = array<i32>} : memref<8x8x32xf32, #tpu.memory_space<vmem>>, vector<8x8x32xf32>,
    %c0_32 = arith.constant 0 : index
    %c0_33 = arith.constant 0 : index
    %c0_34 = arith.constant 0 : index
    %52 = vector.load %arg14[%c0_32, %c0_33, %c0_34] : memref<8x8x32xf32, #tpu.memory_space<vmem>>, vector<8x8x32xf32>
    %cst_35 = arith.constant dense<0.000000e+00> : vector<8x8xf32>
    %53 = vector.multi_reduction <add>, %52, %cst_35 [2] : vector<8x8x32xf32> to vector<8x8xf32>
    %c0_36 = arith.constant 0 : index
    %c0_37 = arith.constant 0 : index
    %c8 = arith.constant 8 : index
    %54 = vector.load %arg10[%c0_36, %c0_37, %c8] : memref<1x8x32xbf16, #tpu.memory_space<vmem>>, vector<1x8x8xbf16>
    %55 = vector.shape_cast %54 : vector<1x8x8xbf16> to vector<8x8xbf16>
    %56 = arith.extf %55 : vector<8x8xbf16> to vector<8x8xf32>
    %57 = arith.addf %53, %56 : vector<8x8xf32>
    %c0_38 = arith.constant 0 : index
    %c0_39 = arith.constant 0 : index
    %c8_40 = arith.constant 8 : index
    %58 = vector.load %arg11[%c0_38, %c0_39, %c8_40] : memref<1x8x32xf32, #tpu.memory_space<vmem>>, vector<1x8x8xf32>
    %59 = vector.shape_cast %58 : vector<1x8x8xf32> to vector<8x8xf32>
    %60 = vector.shape_cast %57 : vector<8x8xf32> to vector<1x8x8xf32>
    tpu.vector_store %arg11[%c0_38, %c0_39, %c8_40], %60 {strides = array<i32>} : memref<1x8x32xf32, #tpu.memory_space<vmem>>, vector<1x8x8xf32>,
    %c2 = arith.constant 2 : index
    %c0_41 = arith.constant 0 : index
    %61 = arith.index_cast %6 : i32 to index
    %c0_42 = arith.constant 0 : index
    %62 = vector.load %arg12[%c2, %c0_41, %61, %c0_42] : memref<4x1x8x32xbf16, #tpu.memory_space<vmem>>, vector<1x1x8x32xbf16>
    %63 = vector.shape_cast %62 : vector<1x1x8x32xbf16> to vector<8x32xbf16>
    %c2_43 = arith.constant 2 : index
    %c0_44 = arith.constant 0 : index
    %c0_45 = arith.constant 0 : index
    %c0_46 = arith.constant 0 : index
    %64 = vector.load %arg13[%c2_43, %c0_44, %c0_45, %c0_46] : memref<4x1x8x32xbf16, #tpu.memory_space<vmem>>, vector<1x1x8x32xbf16>
    %65 = vector.shape_cast %64 : vector<1x1x8x32xbf16> to vector<8x32xbf16>
    %c0_47 = arith.constant 0 : index
    %c0_48 = arith.constant 0 : index
    %66 = vector.load %arg9[%c0_47, %c0_48] : memref<1x32xf32, #tpu.memory_space<vmem>>, vector<1x32xf32>
    %67 = vector.shape_cast %66 : vector<1x32xf32> to vector<32xf32>
    %68 = vector.shape_cast %63 : vector<8x32xbf16> to vector<8x1x32xbf16>
    %69 = vector.shape_cast %65 : vector<8x32xbf16> to vector<1x8x32xbf16>
    %70 = vector.broadcast %68 : vector<8x1x32xbf16> to vector<8x8x32xbf16>
    %71 = vector.broadcast %69 : vector<1x8x32xbf16> to vector<8x8x32xbf16>
    %72 = arith.addf %70, %71 : vector<8x8x32xbf16>
    %73 = math.tanh %72 : vector<8x8x32xbf16>
    %74 = arith.extf %73 : vector<8x8x32xbf16> to vector<8x8x32xf32>
    %75 = vector.shape_cast %67 : vector<32xf32> to vector<1x1x32xf32>
    %76 = vector.broadcast %75 : vector<1x1x32xf32> to vector<8x8x32xf32>
    %77 = arith.mulf %76, %74 : vector<8x8x32xf32>
    %c0_49 = arith.constant 0 : index
    %c0_50 = arith.constant 0 : index
    %c0_51 = arith.constant 0 : index
    %78 = vector.load %arg14[%c0_49, %c0_50, %c0_51] : memref<8x8x32xf32, #tpu.memory_space<vmem>>, vector<8x8x32xf32>
    tpu.vector_store %arg14[%c0_49, %c0_50, %c0_51], %77 {strides = array<i32>} : memref<8x8x32xf32, #tpu.memory_space<vmem>>, vector<8x8x32xf32>,
    %c0_52 = arith.constant 0 : index
    %c0_53 = arith.constant 0 : index
    %c0_54 = arith.constant 0 : index
    %79 = vector.load %arg14[%c0_52, %c0_53, %c0_54] : memref<8x8x32xf32, #tpu.memory_space<vmem>>, vector<8x8x32xf32>
    %cst_55 = arith.constant dense<0.000000e+00> : vector<8x8xf32>
    %80 = vector.multi_reduction <add>, %79, %cst_55 [2] : vector<8x8x32xf32> to vector<8x8xf32>
    %c0_56 = arith.constant 0 : index
    %c0_57 = arith.constant 0 : index
    %c16 = arith.constant 16 : index
    %81 = vector.load %arg10[%c0_56, %c0_57, %c16] : memref<1x8x32xbf16, #tpu.memory_space<vmem>>, vector<1x8x8xbf16>
    %82 = vector.shape_cast %81 : vector<1x8x8xbf16> to vector<8x8xbf16>
    %83 = arith.extf %82 : vector<8x8xbf16> to vector<8x8xf32>
    %84 = arith.addf %80, %83 : vector<8x8xf32>
    %c0_58 = arith.constant 0 : index
    %c0_59 = arith.constant 0 : index
    %c16_60 = arith.constant 16 : index
    %85 = vector.load %arg11[%c0_58, %c0_59, %c16_60] : memref<1x8x32xf32, #tpu.memory_space<vmem>>, vector<1x8x8xf32>
    %86 = vector.shape_cast %85 : vector<1x8x8xf32> to vector<8x8xf32>
    %87 = vector.shape_cast %84 : vector<8x8xf32> to vector<1x8x8xf32>
    tpu.vector_store %arg11[%c0_58, %c0_59, %c16_60], %87 {strides = array<i32>} : memref<1x8x32xf32, #tpu.memory_space<vmem>>, vector<1x8x8xf32>,
    %c3 = arith.constant 3 : index
    %c0_61 = arith.constant 0 : index
    %88 = arith.index_cast %6 : i32 to index
    %c0_62 = arith.constant 0 : index
    %89 = vector.load %arg12[%c3, %c0_61, %88, %c0_62] : memref<4x1x8x32xbf16, #tpu.memory_space<vmem>>, vector<1x1x8x32xbf16>
    %90 = vector.shape_cast %89 : vector<1x1x8x32xbf16> to vector<8x32xbf16>
    %c3_63 = arith.constant 3 : index
    %c0_64 = arith.constant 0 : index
    %c0_65 = arith.constant 0 : index
    %c0_66 = arith.constant 0 : index
    %91 = vector.load %arg13[%c3_63, %c0_64, %c0_65, %c0_66] : memref<4x1x8x32xbf16, #tpu.memory_space<vmem>>, vector<1x1x8x32xbf16>
    %92 = vector.shape_cast %91 : vector<1x1x8x32xbf16> to vector<8x32xbf16>
    %c0_67 = arith.constant 0 : index
    %c0_68 = arith.constant 0 : index
    %93 = vector.load %arg9[%c0_67, %c0_68] : memref<1x32xf32, #tpu.memory_space<vmem>>, vector<1x32xf32>
    %94 = vector.shape_cast %93 : vector<1x32xf32> to vector<32xf32>
    %95 = vector.shape_cast %90 : vector<8x32xbf16> to vector<8x1x32xbf16>
    %96 = vector.shape_cast %92 : vector<8x32xbf16> to vector<1x8x32xbf16>
    %97 = vector.broadcast %95 : vector<8x1x32xbf16> to vector<8x8x32xbf16>
    %98 = vector.broadcast %96 : vector<1x8x32xbf16> to vector<8x8x32xbf16>
    %99 = arith.addf %97, %98 : vector<8x8x32xbf16>
    %100 = math.tanh %99 : vector<8x8x32xbf16>
    %101 = arith.extf %100 : vector<8x8x32xbf16> to vector<8x8x32xf32>
    %102 = vector.shape_cast %94 : vector<32xf32> to vector<1x1x32xf32>
    %103 = vector.broadcast %102 : vector<1x1x32xf32> to vector<8x8x32xf32>
    %104 = arith.mulf %103, %101 : vector<8x8x32xf32>
    %c0_69 = arith.constant 0 : index
    %c0_70 = arith.constant 0 : index
    %c0_71 = arith.constant 0 : index
    %105 = vector.load %arg14[%c0_69, %c0_70, %c0_71] : memref<8x8x32xf32, #tpu.memory_space<vmem>>, vector<8x8x32xf32>
    tpu.vector_store %arg14[%c0_69, %c0_70, %c0_71], %104 {strides = array<i32>} : memref<8x8x32xf32, #tpu.memory_space<vmem>>, vector<8x8x32xf32>,
    %c0_72 = arith.constant 0 : index
    %c0_73 = arith.constant 0 : index
    %c0_74 = arith.constant 0 : index
    %106 = vector.load %arg14[%c0_72, %c0_73, %c0_74] : memref<8x8x32xf32, #tpu.memory_space<vmem>>, vector<8x8x32xf32>
    %cst_75 = arith.constant dense<0.000000e+00> : vector<8x8xf32>
    %107 = vector.multi_reduction <add>, %106, %cst_75 [2] : vector<8x8x32xf32> to vector<8x8xf32>
    %c0_76 = arith.constant 0 : index
    %c0_77 = arith.constant 0 : index
    %c24 = arith.constant 24 : index
    %108 = vector.load %arg10[%c0_76, %c0_77, %c24] : memref<1x8x32xbf16, #tpu.memory_space<vmem>>, vector<1x8x8xbf16>
    %109 = vector.shape_cast %108 : vector<1x8x8xbf16> to vector<8x8xbf16>
    %110 = arith.extf %109 : vector<8x8xbf16> to vector<8x8xf32>
    %111 = arith.addf %107, %110 : vector<8x8xf32>
    %c0_78 = arith.constant 0 : index
    %c0_79 = arith.constant 0 : index
    %c24_80 = arith.constant 24 : index
    %112 = vector.load %arg11[%c0_78, %c0_79, %c24_80] : memref<1x8x32xf32, #tpu.memory_space<vmem>>, vector<1x8x8xf32>
    %113 = vector.shape_cast %112 : vector<1x8x8xf32> to vector<8x8xf32>
    %114 = vector.shape_cast %111 : vector<8x8xf32> to vector<1x8x8xf32>
    tpu.vector_store %arg11[%c0_78, %c0_79, %c24_80], %114 {strides = array<i32>} : memref<1x8x32xf32, #tpu.memory_space<vmem>>, vector<1x8x8xf32>,
    return
  }
  func.func @transform_0(%arg0: i32, %arg1: i32, %arg2: i32) -> (i32, i32, i32) {
    %c0_i32 = arith.constant 0 : i32
    %c0_i32_0 = arith.constant 0 : i32
    %c0_i32_1 = arith.constant 0 : i32
    return %arg0, %c0_i32, %c0_i32_0 : i32, i32, i32
  }
  func.func @transform_1(%arg0: i32, %arg1: i32, %arg2: i32) -> (i32, i32, i32) {
    %c0_i32 = arith.constant 0 : i32
    %c0_i32_0 = arith.constant 0 : i32
    %c0_i32_1 = arith.constant 0 : i32
    return %arg0, %c0_i32, %c0_i32_0 : i32, i32, i32
  }
  func.func @transform_2(%arg0: i32, %arg1: i32, %arg2: i32) -> (i32, i32) {
    %c0_i32 = arith.constant 0 : i32
    %c0_i32_0 = arith.constant 0 : i32
    %c0_i32_1 = arith.constant 0 : i32
    return %c0_i32, %c0_i32_0 : i32, i32
  }
  func.func @transform_3(%arg0: i32, %arg1: i32, %arg2: i32) -> (i32, i32) {
    %c0_i32 = arith.constant 0 : i32
    %c0_i32_0 = arith.constant 0 : i32
    %c0_i32_1 = arith.constant 0 : i32
    return %c0_i32, %c0_i32_0 : i32, i32
  }
  func.func @transform_4(%arg0: i32, %arg1: i32, %arg2: i32) -> (i32, i32) {
    %c0_i32 = arith.constant 0 : i32
    %c0_i32_0 = arith.constant 0 : i32
    %c0_i32_1 = arith.constant 0 : i32
    return %c0_i32, %c0_i32_0 : i32, i32
  }
  func.func @transform_5(%arg0: i32, %arg1: i32, %arg2: i32) -> (i32, i32) {
    %c0_i32 = arith.constant 0 : i32
    %c0_i32_0 = arith.constant 0 : i32
    %c0_i32_1 = arith.constant 0 : i32
    return %c0_i32, %c0_i32_0 : i32, i32
  }
  func.func @transform_6(%arg0: i32, %arg1: i32, %arg2: i32) -> (i32, i32) {
    %c0_i32 = arith.constant 0 : i32
    %c0_i32_0 = arith.constant 0 : i32
    %c0_i32_1 = arith.constant 0 : i32
    return %c0_i32, %c0_i32_0 : i32, i32
  }
  func.func @transform_7(%arg0: i32, %arg1: i32, %arg2: i32) -> (i32, i32, i32) {
    %c1_i32 = arith.constant 1 : i32
    %0 = arith.muli %arg1, %c1_i32 : i32
    %1 = arith.addi %0, %arg2 : i32
    %c0_i32 = arith.constant 0 : i32
    %c0_i32_0 = arith.constant 0 : i32
    return %arg0, %1, %c0_i32 : i32, i32, i32
  }
  func.func @transform_8(%arg0: i32, %arg1: i32, %arg2: i32) -> (i32, i32, i32) {
    %c1_i32 = arith.constant 1 : i32
    %0 = arith.muli %arg1, %c1_i32 : i32
    %1 = arith.addi %0, %arg2 : i32
    %c0_i32 = arith.constant 0 : i32
    %c0_i32_0 = arith.constant 0 : i32
    return %arg0, %1, %c0_i32 : i32, i32, i32
  }
}

</mosaic_0001>

<bundles_post_ra>
// kernel: coreference_separated_forward.2
= control target key start
LH: loop header
LB: loop body
LE: loop exit
PB: predicated region body
PF: predicated region fallthrough
CT: control target
= control target key end

     0   :  { %s1116_s24 = smov 0   ;;  %s1118_s25 = smov 0   ;;  %s1238_s0 = inlined_call_operand.vmem [shape: bf16[2,8,32], index: 0, kind: input, shape index: {}]   ;;  %s1239_s1 = inlined_call_operand.vmem [shape: bf16[32,32], index: 1, kind: input, shape index: {}]   ;;  %s1240_s2 = inlined_call_operand.vmem [shape: f32[1,32], index: 2, kind: input, shape index: {}]   ;;  %s1241_s3 = inlined_call_operand.vmem [shape: bf16[32,32], index: 3, kind: input, shape index: {}]   ;;  %s1242_s4 = inlined_call_operand.vmem [shape: f32[1,32], index: 4, kind: input, shape index: {}]   ;;  %s1243_s5 = inlined_call_operand.vmem [shape: f32[1,32], index: 5, kind: input, shape index: {}]   ;;  %s1244_s6 = inlined_call_operand.vmem [shape: bf16[2,8,8], index: 6, kind: input, shape index: {}]   ;;  %s1245_s7 = inlined_call_operand.vmem [shape: f32[2,8,8], index: 7, kind: output, shape index: {}]  }
   0x1   :  { %s1120_s26 = smov 0  }
   0x2 LB: > { %s36_s27 = sadd.s32 1, %s1066_s25  ;;  %p956_p0 = scmp.ge.s32.totalorder %s1070_s26, 1  ;;  %s1070_s26 = sphi %s1120_s26, %s17_s26   ;;  %s1066_s25 = sphi %s1118_s25, %s1247_s25   ;;  %s1062_s24 = sphi %s1116_s24, %s1246_s24  }
   0x3   : > { %p38_p1 = scmp.ge.s32.totalorder %s36_s27, 2  ;;  %p277_p2 = scmp.lt.s32.totalorder %s1070_s26, 3 }
   0x5   : > { %s1249_s27 = smov (%p38_p1, %s36_s27), 0  ;;  %p278_p3 = pnand %p956_p0, %p277_p2 }
   0x6   : > { %v1028_v0 = vld [vmem:[%s1239_s1] sm:$0xff] (!%p278_p3)   ;;  %v1072_v1 = vmov (!%p278_p3), 0.0   ;;  %v1029_v2 = vld [vmem:[%s1239_s1 + $0x8] sm:$0xff] (!%p278_p3)   ;;  %vm1073_vm0 = vmmov (!%p278_p3), 0   ;;  %p319_p4 = scmp.lt.s32.totalorder (!%p278_p3), %s1062_s24, 1  ;;  %vm370_vm1 = vcmask (!%p278_p3), 261120   ;;  %v503_v7 = vlaneseq (!%p278_p3) }
   0x7   : > { %281 = sbr.rel (%p278_p3) target bundleno = 574 (0x23e), region = 48  ;;  %982 = vmatprep.subr.bf16.mxu0 (!%p278_p3), %v1072_v1  ;;  %990 = vmatprep.subr.bf16.mxu1 (!%p278_p3), %v1072_v1  ;;  %v1030_v3 = vld [vmem:[%s1241_s3] sm:$0xff] (!%p278_p3)   ;;  %v1031_v4 = vld [vmem:[%s1241_s3 + $0x8] sm:$0xff] (!%p278_p3)   ;;  %v1074_v25 = vmov (!%p278_p3), 1966171168   ;;  %vm478_vm2 = vcmask (!%p278_p3), 257024  }
   0x8   : > { %983 = vmatpush3.bf16.msra.mxu0 (!%p278_p3), %v1028_v0  ;;  %986 = vmatprep.mubr.msk.bf16.mxu0 (!%p278_p3), %vm1073_vm0, %v1072_v1  ;;  %v1158_v8 = vshrl.u32 (!%p278_p3), %v503_v7, 7  ;;  %v960_v22 = vld [vmem:[%s1240_s2] ss:$0 sm:$0xff] (!%p278_p3)  ;;  %v501_v26 = vunpack.c.l.s4 (!%p278_p3), %v1074_v25  ;;  %vm840_vm3 = vcmask (!%p278_p3), 1041409   ;;  %vm842_vm4 = vcmask (!%p278_p3), 1042434  }
   0x9   : > { %984 = vmatprep.subr.bf16.mxu0 (!%p278_p3), %v1072_v1  ;;  %994 = vmatprep.mubr.msk.bf16.mxu1 (!%p278_p3), %vm1073_vm0, %v1072_v1  ;;  %v964_v28 = vld [vmem:[%s1242_s4] ss:$0 sm:$0xff] (!%p278_p3)  ;;  %vm844_vm5 = vcmask (!%p278_p3), 1043459   ;;  %vm846_vm6 = vcmask (!%p278_p3), 1044484   ;;  %vm848_vm7 = vcmask (!%p278_p3), 1045509   ;;  %vm850_vm8 = vcmask (!%p278_p3), 1046534  }
   0xa   : > { %991 = vmatpush3.bf16.msra.mxu1 (!%p278_p3), %v1030_v3  ;;  %v711_v10 = vsub.s32 (!%p278_p3), 1, %v1158_v8  ;;  %v718_v12 = vsub.s32 (!%p278_p3), 2, %v1158_v8  ;;  %v725_v14 = vsub.s32 (!%p278_p3), 3, %v1158_v8  ;;  %v1169_v16 = vsub.s32 (!%p278_p3), 0, %v1158_v8 }
   0xb   : > { %992 = vmatprep.subr.bf16.mxu1 (!%p278_p3), %v1072_v1  ;;  %v739_v17 = vsub.s32 (!%p278_p3), 5, %v1158_v8  ;;  %v732_v20 = vsub.s32 (!%p278_p3), 4, %v1158_v8  ;;  %v502_v35 = vunpack.c.0.s8 (!%p278_p3), %v501_v26  ;;  %vm852_vm9 = vcmask (!%p278_p3), 1047559  }
   0xc   : > { %985 = vmatpush3.bf16.msra.mxu0 (!%p278_p3), %v1029_v2  ;;  %vm855_vm10 = vcmask (!%p278_p3), 64512  }
   0xd   : > { %v505_v39 = vsub.s32 (!%p278_p3), %v502_v35, %v1158_v8 }
   0xe   : > { %s1251_s24 = smov (!%p319_p4, %s1062_s24), 1  ;;  %993 = vmatpush3.bf16.msra.mxu1 %v1031_v4 }
   0xf   : > { %s957_s13 = sshll.u32 %s1251_s24, 2  ;;  %s959_s30 = sshll.u32 %s1251_s24, 3 }
  0x10   : > { %s322_s16 = scalar_lea.vmem %s1238_s0, %s957_s13  ;;  %s330_s19 = scalar_lea.vmem %s1244_s6, %s957_s13 }
  0x11   : > { %v346_v5 = vld [vmem:[%s322_s16] sm:$0xf]  ;;  %s339_s10 = scalar_lea.vmem %s1245_s7, %s959_s30 }
  0x12   : > { %987 = vmatmul.mubr.msk.bf16.vlgmr.msra.gmra.mrb[0].mxu0 %vm370_vm1, %v346_v5  ;;  %995 = vmatmul.mubr.msk.bf16.vlgmr.msra.gmra.mrb[0].mxu1 %vm370_vm1, %v346_v5  ;;  %v699_v6 = vld [vmem:[%s330_s19] sm:$0xf] }
  0x13   : > { %v1160_v9 = vunpack.c.l.bf16 %v699_v6 }
  0x15   : > { %v712_v11 = vrot.slane %v1160_v9, %v711_v10  ;;  %v719_v13 = vrot.slane %v1160_v9, %v718_v12  ;;  %v726_v15 = vrot.slane %v1160_v9, %v725_v14  ;;  %v705_v18 = vrot.slane %v1160_v9, %v1169_v16 }
  0x16   : > { %v740_v19 = vrot.slane %v1160_v9, %v739_v17  ;;  %v733_v21 = vrot.slane %v1160_v9, %v732_v20 }
  0x17   : > { %714 = vbcast.lane.b32.xlu1 %v712_v11, 256  ;;  %707 = vbcast.lane.b32.xlu0 %v705_v18, 256 }
  0x1b   : > { %721 = vbcast.lane.b32.xlu1 %v719_v13, 256  ;;  %735 = vbcast.lane.b32.xlu0 %v733_v21, 256 }
  0x1f   : > { %728 = vbcast.lane.b32.xlu1 %v726_v15, 256 }
  0x23   : > { %742 = vbcast.lane.b32.xlu1 %v740_v19, 256 }
  0xe5   : > { %v408_v23 = vpop.f32.mrb[0].mxu0  ;;  %v471_v32 = vpop.f32.mrb[0].mxu1 }
  0xe6   : > { %v409_v24 = vadd.f32 %v960_v22, %v408_v23  ;;  %v988_v27 = vpop.f32.mrb[1].mxu0  ;;  %v472_v33 = vadd.f32 %v964_v28, %v471_v32  ;;  %v996_v34 = vpop.f32.mrb[1].mxu1  ;;  %v973_v32 = vld [vmem:[%s1243_s5] ss:$0 sm:$0xff] }
  0xe7   : > { %v411_v29 = vpop.f32.mrb[2].mxu0  ;;  %v474_v36 = vpop.f32.mrb[2].mxu1 }
  0xe8   : > { %v477_v30 = vpack.c.bf16 %v409_v24, %v409_v24  ;;  %v989_v31 = vpop.f32.mrb[3].mxu0  ;;  %v480_v37 = vpack.c.bf16 %v472_v33, %v472_v33  ;;  %v997_v38 = vpop.f32.mrb[3].mxu1 }
  0xea   : > { %479 = vst.msk [vmem:[#allocation2] sm:$0xf] %vm478_vm2, %v477_v30  ;;  %481 = vst.msk [vmem:[#allocation3] sm:$0xf] %vm478_vm2, %v480_v37 }
  0xf1   : > { %v968_v40 = vld.sshfl [vmem:[#allocation2] sm:$0x33 pattern:$0x75316420]  ;;  %v489_v1 = vld [vmem:[#allocation3] sm:$0xf] }
  0xf2   : > { %v499_v41 = vcombine.high %v968_v40, %v968_v40  ;;  %v506_v42 = vrot.slane %v968_v40, %v505_v39 }
  0xf4   : > { %v513_v43 = vrot.slane %v499_v41, %v505_v39  ;;  %v514_v44 = vcombine.high %v506_v42, %v506_v42  ;;  %v517_v45 = vunpack.i.h.s16 %v506_v42  ;;  %v969_v46 = vpack.i.b16 %v506_v42, %v506_v42 }
  0xf6   : > { %v515_v47 = vcombine.high %v513_v43, %v513_v43  ;;  %v519_v48 = vunpack.i.h.s16 %v513_v43  ;;  %v521_v49 = vunpack.i.h.s16 %v514_v44  ;;  %v525_v50 = vpack.i.b16 %v517_v45, %v517_v45 }
  0xf7   : > { %v970_v51 = vpack.i.b16 %v513_v43, %v513_v43  ;;  %v971_v52 = vpack.i.b16 %v514_v44, %v514_v44  ;;  %v535_v53 = vrot.slane %v969_v46, %v1169_v16 }
  0xf8   : > { %v523_v54 = vunpack.i.h.s16 %v515_v47  ;;  %v527_v55 = vpack.i.b16 %v519_v48, %v519_v48  ;;  %v529_v56 = vpack.i.b16 %v521_v49, %v521_v49  ;;  %v972_v57 = vpack.i.b16 %v515_v47, %v515_v47 }
  0xf9   : > { %v539_v58 = vrot.slane %v525_v50, %v1169_v16  ;;  %v543_v59 = vrot.slane %v970_v51, %v1169_v16  ;;  %v551_v60 = vrot.slane %v971_v52, %v1169_v16  ;;  %v565_v61 = vpack.i.b16 %v535_v53, %v535_v53 }
  0xfa   : > { %v531_v62 = vpack.i.b16 %v523_v54, %v523_v54  ;;  %v547_v63 = vrot.slane %v527_v55, %v1169_v16  ;;  %v555_v0 = vrot.slane %v529_v56, %v1169_v16  ;;  %v559_v2 = vrot.slane %v972_v57, %v1169_v16 }
  0xfb   : > { %v572_v3 = vpack.i.b16 %v539_v58, %v539_v58  ;;  %v570_v4 = vrot.slane %v565_v61, %v1169_v16  ;;  %v579_v5 = vpack.i.b16 %v543_v59, %v543_v59  ;;  %v593_v6 = vpack.i.b16 %v551_v60, %v551_v60 }
  0xfc   : > { %v586_v10 = vpack.i.b16 %v547_v63, %v547_v63  ;;  %v600_v11 = vpack.i.b16 %v555_v0, %v555_v0  ;;  %v607_v12 = vpack.i.b16 %v559_v2, %v559_v2  ;;  %v563_v13 = vrot.slane %v531_v62, %v1169_v16 }
  0xfd   : > { %v620_v14 = vadd.bf16 %v570_v4, %v489_v1  ;;  %v584_v15 = vrot.slane %v579_v5, %v1169_v16  ;;  %v577_v17 = vrot.slane %v572_v3, %v1169_v16  ;;  %v598_v18 = vrot.slane %v593_v6, %v1169_v16 }
  0xfe   : > { %v591_v19 = vrot.slane %v586_v10, %v1169_v16  ;;  %v605_v20 = vrot.slane %v600_v11, %v1169_v16  ;;  %v612_v21 = vrot.slane %v607_v12, %v1169_v16  ;;  %v614_v22 = vpack.i.b16 %v563_v13, %v563_v13 }
  0xff   : > { %1032 = vtanh.bf16 %v620_v14  ;;  %v622_v23 = vadd.bf16 %v584_v15, %v489_v1  ;;  %v621_v24 = vadd.bf16 %v577_v17, %v489_v1  ;;  %v624_v26 = vadd.bf16 %v598_v18, %v489_v1  ;;  %v715_v15 = vpop.permute.xlu1 %714  ;;  %v708_v18 = vpop.permute.xlu0 %707 }
 0x100   : > { %v623_v25 = vadd.bf16 %v591_v19, %v489_v1  ;;  %v619_v27 = vrot.slane %v614_v22, %v1169_v16  ;;  %v625_v28 = vadd.bf16 %v605_v20, %v489_v1  ;;  %v626_v29 = vadd.bf16 %v612_v21, %v489_v1 }
 0x101   : > { %1034 = vtanh.bf16 %v622_v23  ;;  %v1075_v10 = vmov 0   ;;  %v753_v11 = vsub.s32 7, %v1158_v8  ;;  %v746_v12 = vsub.s32 6, %v1158_v8 }
 0x102   : > { %1036 = vtanh.bf16 %v621_v24  ;;  %v627_v30 = vadd.bf16 %v619_v27, %v489_v1  ;;  %1026 = vset.pattern.permute.xlu0 %v1075_v10  ;;  %1027 = vset.pattern.permute.xlu1 %v1075_v10 }
 0x103   : > { %1038 = vtanh.bf16 %v623_v25  ;;  %v754_v13 = vrot.slane %v1160_v9, %v753_v11  ;;  %v747_v14 = vrot.slane %v1160_v9, %v746_v12  ;;  %v722_v17 = vpop.permute.xlu1 %721  ;;  %v736_v20 = vpop.permute.xlu0 %735 }
 0x104   : > { %1040 = vtanh.bf16 %v624_v26 }
 0x105   : > { %1042 = vtanh.bf16 %v625_v28 }
 0x106   : > { %1044 = vtanh.bf16 %v626_v29 }
 0x107   : > { %1046 = vtanh.bf16 %v627_v30  ;;  %v729_v19 = vpop.permute.xlu1 %728 }
 0x10a   : > { %v1033_v31 = vpop.eup %1032 }
 0x10b   : > { %v636_v33 = vunpack.c.l.bf16 %v1033_v31  ;;  %v743_v21 = vpop.permute.xlu1 %742 }
 0x10c   : > { %v1035_v34 = vpop.eup %1034 }
 0x10d   : > { %v1037_v35 = vpop.eup %1036  ;;  %v650_v36 = vmul.f32 %v973_v32, %v636_v33  ;;  %v638_v16 = vunpack.c.l.bf16 %v1035_v34 }
 0x10e   : > { %v1039_v37 = vpop.eup %1038  ;;  %v637_v38 = vunpack.c.l.bf16 %v1037_v35 }
 0x10f   : > { %v1041_v39 = vpop.eup %1040  ;;  %659 = vst.msk [vmem:[#allocation4] sm:$0xff] %vm370_vm1, %v650_v36  ;;  %v652_v40 = vmul.f32 %v973_v32, %v638_v16  ;;  %v639_v41 = vunpack.c.l.bf16 %v1039_v37 }
 0x110   : > { %v1043_v42 = vpop.eup %1042  ;;  %v651_v43 = vmul.f32 %v973_v32, %v637_v38  ;;  %v640_v44 = vunpack.c.l.bf16 %v1041_v39  ;;  %v807_v38 = vand.u32 127, %v503_v7 }
 0x111   : > { %v1045_v45 = vpop.eup %1044  ;;  %661 = vst.msk [vmem:[#allocation4 + $0x10] sm:$0xff] %vm370_vm1, %v652_v40  ;;  %v653_v46 = vmul.f32 %v973_v32, %v639_v41  ;;  %v641_v47 = vunpack.c.l.bf16 %v1043_v42 }
 0x112   : > { %v1047_v48 = vpop.eup %1046  ;;  %660 = vst.msk [vmem:[#allocation4 + $0x8] sm:$0xff] %vm370_vm1, %v651_v43  ;;  %v654_v49 = vmul.f32 %v973_v32, %v640_v44  ;;  %v642_v50 = vunpack.c.l.bf16 %v1045_v45  ;;  %v810_v40 = vsub.s32 %v807_v38, %v1158_v8 }
 0x113   : > { %662 = vst.msk [vmem:[#allocation4 + $0x18] sm:$0xff] %vm370_vm1, %v653_v46  ;;  %v655_v51 = vmul.f32 %v973_v32, %v641_v47  ;;  %v643_v52 = vunpack.c.l.bf16 %v1047_v48 }
 0x114   : > { %663 = vst.msk [vmem:[#allocation4 + $0x20] sm:$0xff] %vm370_vm1, %v654_v49  ;;  %v656_v53 = vmul.f32 %v973_v32, %v642_v50 }
 0x115   : > { %664 = vst.msk [vmem:[#allocation4 + $0x28] sm:$0xff] %vm370_vm1, %v655_v51  ;;  %v657_v54 = vmul.f32 %v973_v32, %v643_v52 }
 0x116   : > { %v667_v55 = vld [vmem:[#allocation4] sm:$0xff]  ;;  %665 = vst.msk [vmem:[#allocation4 + $0x30] sm:$0xff] %vm370_vm1, %v656_v53 }
 0x117   : > { %v675_v56 = vsel %vm370_vm1, %v667_v55, 0.0  ;;  %666 = vst.msk [vmem:[#allocation4 + $0x38] sm:$0xff] %vm370_vm1, %v657_v54 }
 0x118   : > { %676 = vadd.xlane.f32.xlu0 %v675_v56  ;;  %v669_v57 = vld [vmem:[#allocation4 + $0x10] sm:$0xff] }
 0x119   : > { %v681_v58 = vsel %vm370_vm1, %v669_v57, 0.0  ;;  %v668_v59 = vld [vmem:[#allocation4 + $0x8] sm:$0xff] }
 0x11a   : > { %682 = vadd.xlane.f32.xlu1 %v681_v58  ;;  %v670_v60 = vld [vmem:[#allocation4 + $0x18] sm:$0xff]  ;;  %v678_v61 = vsel %vm370_vm1, %v668_v59, 0.0 }
 0x11b   : > { %v671_v62 = vld [vmem:[#allocation4 + $0x20] sm:$0xff]  ;;  %v684_v63 = vsel %vm370_vm1, %v670_v60, 0.0 }
 0x11c   : > { %679 = vadd.xlane.f32.xlu0 %v678_v61  ;;  %v672_v0 = vld [vmem:[#allocation4 + $0x28] sm:$0xff]  ;;  %v687_v1 = vsel %vm370_vm1, %v671_v62, 0.0 }
 0x11d   : > { %v673_v2 = vld [vmem:[#allocation4 + $0x30] sm:$0xff]  ;;  %v690_v3 = vsel %vm370_vm1, %v672_v0, 0.0 }
 0x11e   : > { %685 = vadd.xlane.f32.xlu1 %v684_v63  ;;  %v674_v4 = vld [vmem:[#allocation4 + $0x38] sm:$0xff]  ;;  %v693_v5 = vsel %vm370_vm1, %v673_v2, 0.0 }
 0x11f   : > { %v696_v6 = vsel %vm370_vm1, %v674_v4, 0.0 }
 0x120   : > { %688 = vadd.xlane.f32.xlu0 %v687_v1 }
 0x122   : > { %691 = vadd.xlane.f32.xlu1 %v690_v3 }
 0x124   : > { %694 = vadd.xlane.f32.xlu0 %v693_v5 }
 0x126   : > { %697 = vadd.xlane.f32.xlu1 %v696_v6 }
 0x137   : > { %756 = vbcast.lane.b32.xlu1 %v754_v13, 256 }
 0x13a   : > { %749 = vbcast.lane.b32.xlu0 %v747_v14, 256 }
 0x1a5   : > { %v677_v22 = vpop.xlane.xlu0 %676 }
 0x1a6   : > { %v766_v23 = vadd.f32 %v708_v18, %v677_v22 }
 0x1a7   : > { %v683_v24 = vpop.xlane.xlu1 %682 }
 0x1a8   : > { %783 = vperm.xlu0 %1026, %v766_v23   ;;  %v768_v30 = vadd.f32 %v722_v17, %v683_v24 }
 0x1a9   : > { %v680_v25 = vpop.xlane.xlu0 %679 }
 0x1aa   : > { %v767_v26 = vadd.f32 %v715_v15, %v680_v25 }
 0x1ab   : > { %v686_v27 = vpop.xlane.xlu1 %685 }
 0x1ac   : > { %v769_v28 = vadd.f32 %v729_v19, %v686_v27  ;;  %786 = vperm.xlu1 %1027, %v767_v26  }
 0x1ad   : > { %v689_v29 = vpop.xlane.xlu0 %688 }
 0x1ae   : > { %792 = vperm.xlu0 %1026, %v769_v28   ;;  %v770_v33 = vadd.f32 %v736_v20, %v689_v29 }
 0x1af   : > { %v692_v9 = vpop.xlane.xlu1 %691 }
 0x1b0   : > { %v771_v31 = vadd.f32 %v743_v21, %v692_v9  ;;  %789 = vperm.xlu1 %1027, %v768_v30  }
 0x1b1   : > { %v695_v32 = vpop.xlane.xlu0 %694 }
 0x1b2   : > { %798 = vperm.xlu0 %1026, %v771_v31  }
 0x1b3   : > { %v698_v34 = vpop.xlane.xlu1 %697 }
 0x1b4   : > { %795 = vperm.xlu1 %1027, %v770_v33  }
 0x1b5   : > { %v750_v35 = vpop.permute.xlu0 %749 }
 0x1b6   : > { %v772_v36 = vadd.f32 %v750_v35, %v695_v32 }
 0x1b7   : > { %v757_v16 = vpop.permute.xlu1 %756 }
 0x1b8   : > { %v773_v37 = vadd.f32 %v757_v16, %v698_v34  ;;  %801 = vperm.xlu1 %1027, %v772_v36  }
 0x1ba   : > { %804 = vperm.xlu0 %1026, %v773_v37  }
 0x227   : > { %v784_v39 = vpop.permute.xlu0 %783 }
 0x228   : > { %v811_v44 = vrot.slane %v784_v39, %v810_v40 }
 0x22b   : > { %v787_v41 = vpop.permute.xlu1 %786 }
 0x22c   : > { %v815_v42 = vrot.slane %v787_v41, %v810_v40 }
 0x22d   : > { %v793_v43 = vpop.permute.xlu0 %792 }
 0x22e   : > { %v841_v47 = vsel %vm840_vm3, %v815_v42, %v811_v44  ;;  %v823_v49 = vrot.slane %v793_v43, %v810_v40 }
 0x22f   : > { %v790_v45 = vpop.permute.xlu1 %789 }
 0x230   : > { %v819_v46 = vrot.slane %v790_v45, %v810_v40 }
 0x231   : > { %v799_v51 = vpop.permute.xlu0 %798 }
 0x232   : > { %v843_v48 = vsel %vm842_vm4, %v819_v46, %v841_v47  ;;  %v831_v8 = vrot.slane %v799_v51, %v810_v40 }
 0x233   : > { %v796_v50 = vpop.permute.xlu1 %795  ;;  %v845_v52 = vsel %vm844_vm5, %v823_v49, %v843_v48 }
 0x234   : > { %v827_v7 = vrot.slane %v796_v50, %v810_v40 }
 0x236   : > { %v847_v53 = vsel %vm846_vm6, %v827_v7, %v845_v52 }
 0x237   : > { %v802_v54 = vpop.permute.xlu1 %801  ;;  %v849_v56 = vsel %vm848_vm7, %v831_v8, %v847_v53 }
 0x238   : > { %v835_v55 = vrot.slane %v802_v54, %v810_v40 }
 0x239   : > { %v805_v57 = vpop.permute.xlu0 %804 }
 0x23a   : > { %v851_v58 = vsel %vm850_vm8, %v835_v55, %v849_v56  ;;  %v839_v59 = vrot.slane %v805_v57, %v810_v40 }
 0x23c   : > { %v853_v60 = vsel %vm852_vm9, %v839_v59, %v851_v58 }
 0x23d   : > { %856 = vst.msk [vmem:[%s339_s10] sm:$0xff] %vm855_vm10, %v853_v60 }
 0x23e PF: > { %s17_s26 = sadd.s32 1, %s1070_s26   ;;  %s1246_s24 = smov %s1066_s25 }
 0x23f   : > { %p14_p5 = scmp.ge.s32.totalorder %s17_s26, 4   ;;  %s1247_s25 = smov %s1249_s27 }
 0x241   :  { %16 = sbr.rel (!%p14_p5) target bundleno = 2 (0x2), region = 86 }

// kernel: coreference_separated_forward.3
= control target key start
LH: loop header
LB: loop body
LE: loop exit
PB: predicated region body
PF: predicated region fallthrough
CT: control target
= control target key end

     0   :  { %s2918_s27 = smov 0   ;;  %s2920_s28 = smov 0   ;;  %s3516_s0 = inlined_call_operand.vmem [shape: bf16[2,8,32], index: 0, kind: input, shape index: {}]   ;;  %s3517_s1 = inlined_call_operand.vmem [shape: bf16[2,8,32], index: 1, kind: input, shape index: {}]   ;;  %s3518_s2 = inlined_call_operand.vmem [shape: bf16[32,128], index: 2, kind: input, shape index: {}]   ;;  %s3519_s3 = inlined_call_operand.vmem [shape: f32[1,128], index: 3, kind: input, shape index: {}]   ;;  %s3520_s4 = inlined_call_operand.vmem [shape: bf16[32,128], index: 4, kind: input, shape index: {}]   ;;  %s3521_s5 = inlined_call_operand.vmem [shape: f32[1,128], index: 5, kind: input, shape index: {}]   ;;  %s3522_s6 = inlined_call_operand.vmem [shape: f32[1,32], index: 6, kind: input, shape index: {}]   ;;  %s3523_s7 = inlined_call_operand.vmem [shape: bf16[2,8,32], index: 7, kind: input, shape index: {}]   ;;  %s3524_s8 = inlined_call_operand.vmem [shape: f32[2,8,32], index: 8, kind: output, shape index: {}]  }
   0x1   :  { %s2922_s29 = smov 0  }
   0x2 LB: > { %s37_s30 = sadd.s32 1, %s2860_s28  ;;  %p2575_p0 = scmp.ge.s32.totalorder %s2864_s29, 1  ;;  %s2864_s29 = sphi %s2922_s29, %s18_s29   ;;  %s2860_s28 = sphi %s2920_s28, %s3526_s28   ;;  %s2856_s27 = sphi %s2918_s27, %s3525_s27  }
   0x3   : > { %p39_p1 = scmp.ge.s32.totalorder %s37_s30, 2  ;;  %p311_p2 = scmp.lt.s32.totalorder %s2864_s29, 3 }
   0x5   : > { %s3528_s30 = smov (%p39_p1, %s37_s30), 0  ;;  %p312_p3 = pnand %p2575_p0, %p311_p2 }
   0x6   : > { %v2762_v0 = vld [vmem:[%s3518_s2] sm:$0xff] (!%p312_p3)   ;;  %v2866_v1 = vmov (!%p312_p3), 0.0   ;;  %s2867_s13 = smov (!%p312_p3), 96   ;;  %v2765_v4 = vld [vmem:[%s3518_s2 + $0x8] sm:$0xff] (!%p312_p3)   ;;  %s2868_s18 = smov (!%p312_p3), 64   ;;  %vm2869_vm0 = vmmov (!%p312_p3), 0   ;;  %v985_v19 = vlaneseq (!%p312_p3) }
   0x7   : > { %315 = sbr.rel (%p312_p3) target bundleno = 730 (0x2da), region = 52  ;;  %2665 = vmatprep.subr.bf16.mxu0 (!%p312_p3), %v2866_v1  ;;  %v2763_v2 = vld [vmem:[%s3518_s2] sm:$0xff] (!%p312_p3)   ;;  %2673 = vmatprep.subr.bf16.mxu1 (!%p312_p3), %v2866_v1  ;;  %v2766_v5 = vld [vmem:[%s3518_s2 + $0x8] sm:$0xff] (!%p312_p3)   ;;  %p359_p4 = scmp.lt.s32.totalorder (!%p312_p3), %s2856_s27, 1  ;;  %vm416_vm1 = vcmask (!%p312_p3), 261120   ;;  %vm525_vm2 = vcmask (!%p312_p3), 257024  }
   0x8   : > { %549 = vrot.lane.b32.xlu0 (!%p312_p3), %v2762_v0, %s2867_s13  ;;  %v2764_v3 = vld [vmem:[%s3518_s2] sm:$0xff] (!%p312_p3)   ;;  %2666 = vmatpush3.bf16.msra.mxu0 (!%p312_p3), %v2763_v2  ;;  %v2769_v8 = vld [vmem:[%s3520_s4 + $0x8] sm:$0xff] (!%p312_p3)   ;;  %s2870_s23 = smov (!%p312_p3), 32   ;;  %v3046_v21 = vshrl.u32 (!%p312_p3), %v985_v19, 7  ;;  %vm1322_vm3 = vcmask (!%p312_p3), 1041409   ;;  %vm1324_vm4 = vcmask (!%p312_p3), 1042434  }
   0x9   : > { %2667 = vmatprep.subr.bf16.mxu0 (!%p312_p3), %v2866_v1  ;;  %694 = vrot.lane.b32.xlu1 (!%p312_p3), %v2764_v3, %s2868_s18  ;;  %v2767_v6 = vld [vmem:[%s3520_s4] sm:$0xff] (!%p312_p3)   ;;  %v2770_v9 = vld [vmem:[%s3520_s4 + $0x8] sm:$0xff] (!%p312_p3)   ;;  %vm1326_vm5 = vcmask (!%p312_p3), 1043459   ;;  %vm1328_vm6 = vcmask (!%p312_p3), 1044484   ;;  %vm1330_vm7 = vcmask (!%p312_p3), 1045509   ;;  %vm1332_vm8 = vcmask (!%p312_p3), 1046534  }
   0xa   : > { %2669 = vmatprep.mubr.msk.bf16.mxu0 (!%p312_p3), %vm2869_vm0, %v2866_v1  ;;  %2677 = vmatprep.mubr.msk.bf16.mxu1 (!%p312_p3), %vm2869_vm0, %v2866_v1  ;;  %v2768_v7 = vld [vmem:[%s3520_s4] sm:$0xff] (!%p312_p3)   ;;  %v2771_v10 = vld [vmem:[%s3518_s2 + $0x8] sm:$0xff] (!%p312_p3)   ;;  %v1193_v23 = vsub.s32 (!%p312_p3), 1, %v3046_v21  ;;  %v3055_v25 = vsub.s32 (!%p312_p3), 0, %v3046_v21  ;;  %v3059_v27 = vsub.s32 (!%p312_p3), 4, %v3046_v21  ;;  %v1200_v29 = vsub.s32 (!%p312_p3), 2, %v3046_v21 }
   0xb   : > { %2674 = vmatpush3.bf16.msra.mxu1 (!%p312_p3), %v2768_v7  ;;  %v2772_v12 = vld [vmem:[%s3520_s4] sm:$0xff] (!%p312_p3)   ;;  %v2775_v14 = vld [vmem:[%s3518_s2 + $0x8] sm:$0xff] (!%p312_p3)   ;;  %v3066_v31 = vsub.s32 (!%p312_p3), 6, %v3046_v21  ;;  %v1207_v33 = vsub.s32 (!%p312_p3), 3, %v3046_v21  ;;  %v1221_v37 = vsub.s32 (!%p312_p3), 5, %v3046_v21  ;;  %v1235_v41 = vsub.s32 (!%p312_p3), 7, %v3046_v21 }
   0xc   : > { %551 = vrot.lane.b32.xlu0 (!%p312_p3), %v2765_v4, %s2867_s13  ;;  %2668 = vmatpush3.bf16.msra.mxu0 (!%p312_p3), %v2766_v5  ;;  %v2773_v13 = vld [vmem:[%s3518_s2] sm:$0xff] (!%p312_p3)   ;;  %v2774_v15 = vld [vmem:[%s3520_s4 + $0x8] sm:$0xff] (!%p312_p3)   ;;  %vm1334_vm9 = vcmask (!%p312_p3), 1047559   ;;  %vm1337_vm10 = vcmask (!%p312_p3), 64512   ;;  %vm1709_vm11 = vcmask (!%p312_p3), 130112   ;;  %vm2081_vm12 = vcmask (!%p312_p3), 195712  }
   0xd   : > { %618 = vrot.lane.b32.xlu1 (!%p312_p3), %v2767_v6, %s2867_s13  ;;  %2675 = vmatprep.subr.bf16.mxu1 (!%p312_p3), %v2866_v1  ;;  %v2776_v16 = vld [vmem:[%s3520_s4] sm:$0xff] (!%p312_p3)   ;;  %v2777_v17 = vld [vmem:[%s3520_s4 + $0x8] sm:$0xff] (!%p312_p3)   ;;  %vm2453_vm13 = vcmask (!%p312_p3), 261312  }
   0xe   : > { %s3530_s27 = smov (!%p359_p4, %s2856_s27), 1  ;;  %2681 = vmatprep.subr.bf16.mxu0 %v2866_v1  ;;  %v3028_v18 = vld [vmem:[%s3519_s3] ss:$0 sm:$0xff] }
   0xf   : > { %s2977_s9 = sshll.u32 %s3530_s27, 2  ;;  %2676 = vmatpush3.bf16.msra.mxu1 %v2770_v9  ;;  %v3033_v20 = vld [vmem:[%s3521_s5] ss:$0 sm:$0xff]  ;;  %s2579_s26 = sshll.u32 %s3530_s27, 3 }
  0x10   : > { %s362_s15 = scalar_lea.vmem %s3516_s0, %s2977_s9  ;;  %696 = vrot.lane.b32.xlu0 %v2771_v10, %s2868_s18  ;;  %2689 = vmatprep.subr.bf16.mxu1 %v2866_v1  ;;  %s3039_s24 = scalar_lea.vmem %s3523_s7, %s2977_s9 }
  0x11   : > { %v2992_v11 = vld [vmem:[%s362_s15] sm:$0xf]  ;;  %620 = vrot.lane.b32.xlu1 %v2769_v8, %s2867_s13  ;;  %s3472_s12 = scalar_lea.vmem %s3524_s8, %s2579_s26 }
  0x12   : > { %2670 = vmatmul.mubr.msk.bf16.vlgmr.msra.gmra.mrb[0].mxu0 %vm416_vm1, %v2992_v11  ;;  %2678 = vmatmul.mubr.msk.bf16.vlgmr.msra.gmra.mrb[0].mxu1 %vm416_vm1, %v2992_v11  ;;  %v1181_v22 = vld [vmem:[%s3039_s24] sm:$0xf] }
  0x13   : > { %2685 = vmatprep.mubr.msk.bf16.mxu0 %vm2869_vm0, %v2866_v1  ;;  %2693 = vmatprep.mubr.msk.bf16.mxu1 %vm2869_vm0, %v2866_v1  ;;  %v1182_v24 = vunpack.c.l.bf16 %v1181_v22  ;;  %v1553_v34 = vld [vmem:[%s3039_s24] sm:$0xf] }
  0x14   : > { %839 = vrot.lane.b32.xlu0 %v2773_v13, %s2870_s23  ;;  %v1554_v38 = vunpack.c.l.bf16 %v1553_v34  ;;  %v1925_v46 = vld [vmem:[%s3039_s24] sm:$0xf] }
  0x15   : > { %763 = vrot.lane.b32.xlu1 %v2772_v12, %s2868_s18  ;;  %v1194_v26 = vrot.slane %v1182_v24, %v1193_v23  ;;  %v1187_v28 = vrot.slane %v1182_v24, %v3055_v25  ;;  %v1215_v30 = vrot.slane %v1182_v24, %v3059_v27  ;;  %v1201_v32 = vrot.slane %v1182_v24, %v1200_v29  ;;  %v2297_v48 = vld [vmem:[%s3039_s24] sm:$0xf] }
  0x16   : > { %v1229_v35 = vrot.slane %v1182_v24, %v3066_v31  ;;  %v1208_v36 = vrot.slane %v1182_v24, %v1207_v33  ;;  %v1559_v39 = vrot.slane %v1554_v38, %v3055_v25  ;;  %v1222_v40 = vrot.slane %v1182_v24, %v1221_v37 }
  0x17   : > { %v1583_v42 = vrot.slane %v1554_v38, %v1207_v33  ;;  %v1236_v43 = vrot.slane %v1182_v24, %v1235_v41  ;;  %v1599_v44 = vrot.slane %v1554_v38, %v1221_v37  ;;  %v1567_v45 = vrot.slane %v1554_v38, %v1193_v23 }
  0x18   : > { %841 = vrot.lane.b32.xlu0 %v2775_v14, %s2870_s23  ;;  %v1615_v47 = vrot.slane %v1554_v38, %v1235_v41  ;;  %v1575_v49 = vrot.slane %v1554_v38, %v1200_v29  ;;  %v1926_v50 = vunpack.c.l.bf16 %v1925_v46  ;;  %v2298_v51 = vunpack.c.l.bf16 %v2297_v48 }
  0x19   : > { %765 = vrot.lane.b32.xlu1 %v2774_v15, %s2868_s18  ;;  %v1591_v53 = vrot.slane %v1554_v38, %v3059_v27  ;;  %v1607_v55 = vrot.slane %v1554_v38, %v3066_v31 }
  0x1a   : > { %v1931_v52 = vrot.slane %v1926_v50, %v3055_v25  ;;  %v2303_v54 = vrot.slane %v2298_v51, %v3055_v25  ;;  %v1955_v56 = vrot.slane %v1926_v50, %v1207_v33  ;;  %v1939_v57 = vrot.slane %v1926_v50, %v1193_v23 }
  0x1b   : > { %v1947_v58 = vrot.slane %v1926_v50, %v1200_v29  ;;  %v2311_v59 = vrot.slane %v2298_v51, %v1193_v23  ;;  %v2319_v60 = vrot.slane %v2298_v51, %v1200_v29  ;;  %v1963_v61 = vrot.slane %v1926_v50, %v3059_v27 }
  0x1c   : > { %908 = vrot.lane.b32.xlu0 %v2776_v16, %s2870_s23  ;;  %v2327_v62 = vrot.slane %v2298_v51, %v1207_v33  ;;  %v1971_v63 = vrot.slane %v1926_v50, %v1221_v37  ;;  %v2335_v0 = vrot.slane %v2298_v51, %v3059_v27  ;;  %v1979_v2 = vrot.slane %v1926_v50, %v3066_v31 }
  0x1d   : > { %910 = vrot.lane.b32.xlu1 %v2777_v17, %s2870_s23  ;;  %v2343_v3 = vrot.slane %v2298_v51, %v1221_v37  ;;  %v1987_v4 = vrot.slane %v1926_v50, %v1235_v41  ;;  %v2351_v5 = vrot.slane %v2298_v51, %v3066_v31  ;;  %v2359_v6 = vrot.slane %v2298_v51, %v1235_v41 }
  0x20   : > { %555 = vrot.lane.b32.xlu0 %v3028_v18, %s2867_s13 }
  0x21   : > { %624 = vrot.lane.b32.xlu1 %v3033_v20, %s2867_s13 }
  0x24   : > { %700 = vrot.lane.b32.xlu0 %v3028_v18, %s2868_s18 }
  0x25   : > { %769 = vrot.lane.b32.xlu1 %v3033_v20, %s2868_s18 }
  0x28   : > { %845 = vrot.lane.b32.xlu0 %v3028_v18, %s2870_s23 }
  0x29   : > { %914 = vrot.lane.b32.xlu1 %v3033_v20, %s2870_s23  ;;  %s366_s23 = scalar_lea.vmem %s3517_s1, %s2977_s9 }
  0x2c   : > { %1196 = vbcast.lane.b32.xlu0 %v1194_v26, 256  ;;  %v391_v26 = vld [vmem:[%s366_s23] sm:$0xf] }
  0x2d   : > { %1189 = vbcast.lane.b32.xlu1 %v1187_v28, 256  ;;  %v2871_v28 = vmov 1966171168   ;;  %v3119_v33 = vunpack.c.l.bf16 %v391_v26 }
  0x2e   : > { %v983_v29 = vunpack.c.l.s4 %v2871_v28 }
  0x30   : > { %1217 = vbcast.lane.b32.xlu0 %v1215_v30, 256 }
  0x31   : > { %1203 = vbcast.lane.b32.xlu1 %v1201_v32, 256 }
  0x34   : > { %1231 = vbcast.lane.b32.xlu0 %v1229_v35, 256 }
  0x35   : > { %1210 = vbcast.lane.b32.xlu1 %v1208_v36, 256 }
  0x38   : > { %1562 = vbcast.lane.b32.xlu0 %v1559_v39, 264 }
  0x39   : > { %1224 = vbcast.lane.b32.xlu1 %v1222_v40, 256 }
  0x3c   : > { %1586 = vbcast.lane.b32.xlu0 %v1583_v42, 264 }
  0x3d   : > { %1238 = vbcast.lane.b32.xlu1 %v1236_v43, 256 }
  0x40   : > { %1602 = vbcast.lane.b32.xlu0 %v1599_v44, 264 }
  0x41   : > { %1570 = vbcast.lane.b32.xlu1 %v1567_v45, 264 }
  0x44   : > { %1618 = vbcast.lane.b32.xlu0 %v1615_v47, 264 }
  0x45   : > { %1578 = vbcast.lane.b32.xlu1 %v1575_v49, 264 }
  0x48   : > { %1934 = vbcast.lane.b32.xlu0 %v1931_v52, 272 }
  0x49   : > { %1594 = vbcast.lane.b32.xlu1 %v1591_v53, 264 }
  0x4c   : > { %2306 = vbcast.lane.b32.xlu0 %v2303_v54, 280 }
  0x4d   : > { %1610 = vbcast.lane.b32.xlu1 %v1607_v55, 264 }
  0x50   : > { %1958 = vbcast.lane.b32.xlu0 %v1955_v56, 272 }
  0x51   : > { %1942 = vbcast.lane.b32.xlu1 %v1939_v57, 272 }
  0x54   : > { %1966 = vbcast.lane.b32.xlu0 %v1963_v61, 272 }
  0x55   : > { %1950 = vbcast.lane.b32.xlu1 %v1947_v58, 272 }
  0x58   : > { %1974 = vbcast.lane.b32.xlu0 %v1971_v63, 272 }
  0x59   : > { %2314 = vbcast.lane.b32.xlu1 %v2311_v59, 280 }
  0x5c   : > { %1982 = vbcast.lane.b32.xlu0 %v1979_v2, 272 }
  0x5d   : > { %2322 = vbcast.lane.b32.xlu1 %v2319_v60, 280 }
  0x60   : > { %1990 = vbcast.lane.b32.xlu0 %v1987_v4, 272 }
  0x61   : > { %2330 = vbcast.lane.b32.xlu1 %v2327_v62, 280 }
  0x64   : > { %2362 = vbcast.lane.b32.xlu0 %v2359_v6, 280 }
  0x65   : > { %2338 = vbcast.lane.b32.xlu1 %v2335_v0, 280 }
  0x69   : > { %2346 = vbcast.lane.b32.xlu1 %v2343_v3, 280 }
  0x6d   : > { %2354 = vbcast.lane.b32.xlu1 %v2351_v5, 280 }
  0x7a   : > { %v550_v7 = vpop.permute.xlu0 %549 }
  0x7b   : > { %2682 = vmatpush3.bf16.msra.mxu0 %v550_v7  ;;  %v695_v8 = vpop.permute.xlu1 %694 }
  0x7c   : > { %2683 = vmatprep.subr.bf16.mxu0 %v2866_v1 }
  0x7e   : > { %v552_v9 = vpop.permute.xlu0 %551 }
  0x7f   : > { %2684 = vmatpush3.bf16.msra.mxu0 %v552_v9  ;;  %v619_v10 = vpop.permute.xlu1 %618 }
  0x80   : > { %2697 = vmatprep.subr.bf16.mxu0 %v2866_v1  ;;  %2690 = vmatpush3.bf16.msra.mxu1 %v619_v10 }
  0x81   : > { %2691 = vmatprep.subr.bf16.mxu1 %v2866_v1 }
  0x82   : > { %2686 = vmatmul.mubr.msk.bf16.vlgmr.msra.gmra.mrb[4].mxu0 %vm416_vm1, %v2992_v11  ;;  %v697_v12 = vpop.permute.xlu0 %696 }
  0x83   : > { %2698 = vmatpush3.bf16.msra.mxu0 %v695_v8  ;;  %2701 = vmatprep.mubr.msk.bf16.mxu0 %vm2869_vm0, %v2866_v1  ;;  %v621_v13 = vpop.permute.xlu1 %620 }
  0x84   : > { %2699 = vmatprep.subr.bf16.mxu0 %v2866_v1  ;;  %2692 = vmatpush3.bf16.msra.mxu1 %v621_v13 }
  0x85   : > { %2705 = vmatprep.subr.bf16.mxu1 %v2866_v1 }
  0x86   : > { %v840_v14 = vpop.permute.xlu0 %839 }
  0x87   : > { %2700 = vmatpush3.bf16.msra.mxu0 %v697_v12  ;;  %2694 = vmatmul.mubr.msk.bf16.vlgmr.msra.gmra.mrb[4].mxu1 %vm416_vm1, %v2992_v11  ;;  %v764_v15 = vpop.permute.xlu1 %763 }
  0x88   : > { %2713 = vmatprep.subr.bf16.mxu0 %v2866_v1  ;;  %2706 = vmatpush3.bf16.msra.mxu1 %v764_v15 }
  0x89   : > { %2709 = vmatprep.mubr.msk.bf16.mxu1 %vm2869_vm0, %v2866_v1  ;;  %2707 = vmatprep.subr.bf16.mxu1 %v2866_v1 }
  0x8a   : > { %2702 = vmatmul.mubr.msk.bf16.vlgmr.msra.gmra.mrb[8].mxu0 %vm416_vm1, %v2992_v11  ;;  %v842_v16 = vpop.permute.xlu0 %841 }
  0x8b   : > { %2714 = vmatpush3.bf16.msra.mxu0 %v840_v14  ;;  %2717 = vmatprep.mubr.msk.bf16.mxu0 %vm2869_vm0, %v2866_v1  ;;  %v766_v17 = vpop.permute.xlu1 %765 }
  0x8c   : > { %2715 = vmatprep.subr.bf16.mxu0 %v2866_v1  ;;  %2708 = vmatpush3.bf16.msra.mxu1 %v766_v17 }
  0x8d   : > { %2721 = vmatprep.subr.bf16.mxu1 %v2866_v1 }
  0x8e   : > { %v909_v22 = vpop.permute.xlu0 %908 }
  0x8f   : > { %2716 = vmatpush3.bf16.msra.mxu0 %v842_v16  ;;  %2710 = vmatmul.mubr.msk.bf16.vlgmr.msra.gmra.mrb[8].mxu1 %vm416_vm1, %v2992_v11  ;;  %v911_v23 = vpop.permute.xlu1 %910 }
  0x90   : > { %2722 = vmatpush3.bf16.msra.mxu1 %v909_v22  ;;  %2725 = vmatprep.mubr.msk.bf16.mxu1 %vm2869_vm0, %v2866_v1 }
  0x91   : > { %2723 = vmatprep.subr.bf16.mxu1 %v2866_v1 }
  0x92   : > { %2718 = vmatmul.mubr.msk.bf16.vlgmr.msra.gmra.mrb[12].mxu0 %vm416_vm1, %v2992_v11 }
  0x94   : > { %2724 = vmatpush3.bf16.msra.mxu1 %v911_v23 }
  0x97   : > { %2726 = vmatmul.mubr.msk.bf16.vlgmr.msra.gmra.mrb[12].mxu1 %vm416_vm1, %v2992_v11  ;;  %v984_v11 = vunpack.c.0.s8 %v983_v29 }
  0x99   : > { %v3125_v39 = vsub.s32 %v984_v11, %v3046_v21  ;;  %v3149_v11 = vld [vmem:[%s3522_s6] ss:$0 sm:$0xff] }
  0xe5   : > { %v454_v24 = vpop.f32.mrb[0].mxu0  ;;  %v517_v34 = vpop.f32.mrb[0].mxu1 }
  0xe6   : > { %v455_v27 = vadd.f32 %v3028_v18, %v454_v24  ;;  %v2671_v30 = vpop.f32.mrb[1].mxu0  ;;  %v518_v35 = vadd.f32 %v3033_v20, %v517_v34  ;;  %v2679_v36 = vpop.f32.mrb[1].mxu1 }
  0xe7   : > { %v457_v31 = vpop.f32.mrb[2].mxu0  ;;  %v520_v37 = vpop.f32.mrb[2].mxu1 }
  0xe8   : > { %v524_v32 = vpack.c.bf16 %v455_v27, %v455_v27  ;;  %v2672_v1 = vpop.f32.mrb[3].mxu0  ;;  %v523_v38 = vadd.f32 %v518_v35, %v3119_v33  ;;  %v2680_v18 = vpop.f32.mrb[3].mxu1 }
  0xea   : > { %526 = vst.msk [vmem:[#allocation2] sm:$0xf] %vm525_vm2, %v524_v32  ;;  %v527_v40 = vpack.c.bf16 %v523_v38, %v523_v38 }
  0xec   : > { %528 = vst.msk [vmem:[#allocation3] sm:$0xf] %vm525_vm2, %v527_v40 }
  0xf1   : > { %v2612_v41 = vld.sshfl [vmem:[#allocation2] sm:$0x33 pattern:$0x75316420] }
  0xf2   : > { %v981_v42 = vcombine.high %v2612_v41, %v2612_v41  ;;  %v988_v43 = vrot.slane %v2612_v41, %v3125_v39 }
  0xf3   : > { %v971_v2 = vld [vmem:[#allocation3] sm:$0xf] }
  0xf4   : > { %v995_v44 = vrot.slane %v981_v42, %v3125_v39  ;;  %v996_v45 = vcombine.high %v988_v43, %v988_v43  ;;  %v999_v46 = vunpack.i.h.s16 %v988_v43  ;;  %v2613_v20 = vpack.i.b16 %v988_v43, %v988_v43 }
  0xf6   : > { %v997_v47 = vcombine.high %v995_v44, %v995_v44  ;;  %v1001_v48 = vunpack.i.h.s16 %v995_v44  ;;  %v1003_v49 = vunpack.i.h.s16 %v996_v45  ;;  %v1007_v50 = vpack.i.b16 %v999_v46, %v999_v46 }
  0xf7   : > { %v2614_v51 = vpack.i.b16 %v995_v44, %v995_v44  ;;  %v2615_v52 = vpack.i.b16 %v996_v45, %v996_v45  ;;  %v1017_v53 = vrot.slane %v2613_v20, %v3055_v25 }
  0xf8   : > { %v1005_v54 = vunpack.i.h.s16 %v997_v47  ;;  %v1009_v55 = vpack.i.b16 %v1001_v48, %v1001_v48  ;;  %v1011_v56 = vpack.i.b16 %v1003_v49, %v1003_v49  ;;  %v2616_v57 = vpack.i.b16 %v997_v47, %v997_v47 }
  0xf9   : > { %v1021_v58 = vrot.slane %v1007_v50, %v3055_v25  ;;  %v1025_v59 = vrot.slane %v2614_v51, %v3055_v25  ;;  %v1033_v60 = vrot.slane %v2615_v52, %v3055_v25  ;;  %v1047_v61 = vpack.i.b16 %v1017_v53, %v1017_v53 }
  0xfa   : > { %v1013_v62 = vpack.i.b16 %v1005_v54, %v1005_v54  ;;  %v1029_v63 = vrot.slane %v1009_v55, %v3055_v25  ;;  %v1037_v0 = vrot.slane %v1011_v56, %v3055_v25  ;;  %v1041_v3 = vrot.slane %v2616_v57, %v3055_v25 }
  0xfb   : > { %v1054_v4 = vpack.i.b16 %v1021_v58, %v1021_v58  ;;  %v1052_v5 = vrot.slane %v1047_v61, %v3055_v25  ;;  %v1061_v6 = vpack.i.b16 %v1025_v59, %v1025_v59  ;;  %v1075_v7 = vpack.i.b16 %v1033_v60, %v1033_v60 }
  0xfc   : > { %v1068_v8 = vpack.i.b16 %v1029_v63, %v1029_v63  ;;  %v1089_v9 = vpack.i.b16 %v1041_v3, %v1041_v3  ;;  %v1082_v10 = vpack.i.b16 %v1037_v0, %v1037_v0  ;;  %v1045_v12 = vrot.slane %v1013_v62, %v3055_v25 }
  0xfd   : > { %v1102_v13 = vadd.bf16 %v1052_v5, %v971_v2  ;;  %v1059_v14 = vrot.slane %v1054_v4, %v3055_v25  ;;  %v1066_v15 = vrot.slane %v1061_v6, %v3055_v25  ;;  %v1080_v16 = vrot.slane %v1075_v7, %v3055_v25 }
  0xfe   : > { %v1073_v17 = vrot.slane %v1068_v8, %v3055_v25  ;;  %v1094_v22 = vrot.slane %v1089_v9, %v3055_v25  ;;  %v1087_v23 = vrot.slane %v1082_v10, %v3055_v25  ;;  %v1096_v24 = vpack.i.b16 %v1045_v12, %v1045_v12  ;;  %v625_v12 = vpop.permute.xlu1 %624 }
  0xff   : > { %2778 = vtanh.bf16 %v1102_v13  ;;  %v1103_v26 = vadd.bf16 %v1059_v14, %v971_v2  ;;  %v1104_v27 = vadd.bf16 %v1066_v15, %v971_v2  ;;  %v1106_v28 = vadd.bf16 %v1080_v16, %v971_v2  ;;  %v556_v13 = vpop.permute.xlu0 %555 }
 0x100   : > { %v1105_v29 = vadd.bf16 %v1073_v17, %v971_v2  ;;  %v1101_v30 = vrot.slane %v1096_v24, %v3055_v25  ;;  %v1108_v31 = vadd.bf16 %v1094_v22, %v971_v2  ;;  %v1107_v32 = vadd.bf16 %v1087_v23, %v971_v2 }
 0x101   : > { %2780 = vtanh.bf16 %v1103_v26  ;;  %v2872_v10 = vmov 0  }
 0x102   : > { %2782 = vtanh.bf16 %v1104_v27  ;;  %v1109_v1 = vadd.bf16 %v1101_v30, %v971_v2  ;;  %2761 = vset.pattern.permute.xlu1 %v2872_v10  ;;  %2760 = vset.pattern.permute.xlu0 %v2872_v10  ;;  %v770_v17 = vpop.permute.xlu1 %769 }
 0x103   : > { %2784 = vtanh.bf16 %v1106_v28  ;;  %v701_v26 = vpop.permute.xlu0 %700 }
 0x104   : > { %2786 = vtanh.bf16 %v1105_v29 }
 0x105   : > { %2788 = vtanh.bf16 %v1108_v31 }
 0x106   : > { %2790 = vtanh.bf16 %v1107_v32  ;;  %v3176_v28 = vpop.permute.xlu1 %914 }
 0x107   : > { %2792 = vtanh.bf16 %v1109_v1 }
 0x10a   : > { %v2779_v34 = vpop.eup %2778 }
 0x10b   : > { %v1118_v35 = vunpack.c.l.bf16 %v2779_v34 }
 0x10c   : > { %v2781_v36 = vpop.eup %2780 }
 0x10d   : > { %v2783_v37 = vpop.eup %2782  ;;  %v1132_v38 = vmul.f32 %v3149_v11, %v1118_v35  ;;  %v1119_v18 = vunpack.c.l.bf16 %v2781_v36 }
 0x10e   : > { %v2785_v40 = vpop.eup %2784  ;;  %v1120_v41 = vunpack.c.l.bf16 %v2783_v37 }
 0x10f   : > { %v2787_v42 = vpop.eup %2786  ;;  %1141 = vst.msk [vmem:[#allocation4] sm:$0xff] %vm416_vm1, %v1132_v38  ;;  %v1133_v43 = vmul.f32 %v3149_v11, %v1119_v18  ;;  %v1122_v44 = vunpack.c.l.bf16 %v2785_v40 }
 0x110   : > { %v2789_v45 = vpop.eup %2788  ;;  %v1134_v46 = vmul.f32 %v3149_v11, %v1120_v41  ;;  %v1121_v20 = vunpack.c.l.bf16 %v2787_v42 }
 0x111   : > { %v2791_v47 = vpop.eup %2790  ;;  %1142 = vst.msk [vmem:[#allocation4 + $0x8] sm:$0xff] %vm416_vm1, %v1133_v43  ;;  %v1136_v48 = vmul.f32 %v3149_v11, %v1122_v44  ;;  %v1124_v49 = vunpack.c.l.bf16 %v2789_v45  ;;  %v3182_v44 = vpop.permute.xlu1 %1189 }
 0x112   : > { %v2793_v50 = vpop.eup %2792  ;;  %1143 = vst.msk [vmem:[#allocation4 + $0x10] sm:$0xff] %vm416_vm1, %v1134_v46  ;;  %v1135_v51 = vmul.f32 %v3149_v11, %v1121_v20  ;;  %v1123_v52 = vunpack.c.l.bf16 %v2791_v47  ;;  %v846_v46 = vpop.permute.xlu0 %845 }
 0x113   : > { %1145 = vst.msk [vmem:[#allocation4 + $0x20] sm:$0xff] %vm416_vm1, %v1136_v48  ;;  %v1138_v53 = vmul.f32 %v3149_v11, %v1124_v49  ;;  %v1125_v54 = vunpack.c.l.bf16 %v2793_v50 }
 0x114   : > { %1144 = vst.msk [vmem:[#allocation4 + $0x18] sm:$0xff] %vm416_vm1, %v1135_v51  ;;  %v1137_v55 = vmul.f32 %v3149_v11, %v1123_v52 }
 0x115   : > { %1147 = vst.msk [vmem:[#allocation4 + $0x30] sm:$0xff] %vm416_vm1, %v1138_v53  ;;  %v1139_v56 = vmul.f32 %v3149_v11, %v1125_v54 }
 0x116   : > { %v1149_v57 = vld [vmem:[#allocation4] sm:$0xff]  ;;  %1146 = vst.msk [vmem:[#allocation4 + $0x28] sm:$0xff] %vm416_vm1, %v1137_v55 }
 0x117   : > { %v1157_v58 = vsel %vm416_vm1, %v1149_v57, 0.0  ;;  %1148 = vst.msk [vmem:[#allocation4 + $0x38] sm:$0xff] %vm416_vm1, %v1139_v56 }
 0x118   : > { %1158 = vadd.xlane.f32.xlu0 %v1157_v58  ;;  %v1150_v59 = vld [vmem:[#allocation4 + $0x8] sm:$0xff] }
 0x119   : > { %v1160_v60 = vsel %vm416_vm1, %v1150_v59, 0.0  ;;  %v1151_v61 = vld [vmem:[#allocation4 + $0x10] sm:$0xff] }
 0x11a   : > { %1161 = vadd.xlane.f32.xlu1 %v1160_v60  ;;  %v1163_v62 = vsel %vm416_vm1, %v1151_v61, 0.0  ;;  %v1153_v63 = vld [vmem:[#allocation4 + $0x20] sm:$0xff] }
 0x11b   : > { %v1169_v0 = vsel %vm416_vm1, %v1153_v63, 0.0  ;;  %v1152_v2 = vld [vmem:[#allocation4 + $0x18] sm:$0xff] }
 0x11c   : > { %1164 = vadd.xlane.f32.xlu0 %v1163_v62  ;;  %v1155_v3 = vld [vmem:[#allocation4 + $0x30] sm:$0xff]  ;;  %v1166_v4 = vsel %vm416_vm1, %v1152_v2, 0.0 }
 0x11d   : > { %v1154_v5 = vld [vmem:[#allocation4 + $0x28] sm:$0xff]  ;;  %v1175_v6 = vsel %vm416_vm1, %v1155_v3, 0.0 }
 0x11e   : > { %1170 = vadd.xlane.f32.xlu1 %v1169_v0  ;;  %v1172_v7 = vsel %vm416_vm1, %v1154_v5, 0.0  ;;  %v1156_v8 = vld [vmem:[#allocation4 + $0x38] sm:$0xff] }
 0x11f   : > { %v1178_v9 = vsel %vm416_vm1, %v1156_v8, 0.0 }
 0x120   : > { %1167 = vadd.xlane.f32.xlu0 %v1166_v4 }
 0x122   : > { %1176 = vadd.xlane.f32.xlu1 %v1175_v6 }
 0x124   : > { %1173 = vadd.xlane.f32.xlu0 %v1172_v7 }
 0x128   : > { %1179 = vadd.xlane.f32.xlu0 %v1178_v9 }
 0x155   : > { %v592_v14 = vpop.f32.mrb[4].mxu0 }
 0x156   : > { %v593_v15 = vadd.f32 %v592_v14, %v556_v13  ;;  %v2687_v16 = vpop.f32.mrb[5].mxu0 }
 0x157   : > { %v595_v22 = vpop.f32.mrb[6].mxu0 }
 0x158   : > { %v668_v23 = vpack.c.bf16 %v593_v15, %v593_v15  ;;  %v2688_v24 = vpop.f32.mrb[7].mxu0  ;;  %v3201_v22 = vpop.permute.xlu1 %1203 }
 0x15a   : > { %670 = vst.msk [vmem:[#allocation2 + $0x4] sm:$0xf] %vm525_vm2, %v668_v23  ;;  %v661_v27 = vpop.f32.mrb[4].mxu1 }
 0x15b   : > { %v662_v29 = vadd.f32 %v661_v27, %v625_v12  ;;  %v2695_v30 = vpop.f32.mrb[5].mxu1 }
 0x15c   : > { %v664_v31 = vpop.f32.mrb[6].mxu1  ;;  %v3205_v30 = vpop.permute.xlu0 %1196 }
 0x15d   : > { %v737_v32 = vpop.f32.mrb[8].mxu0  ;;  %v667_v1 = vadd.f32 %v662_v29, %v3119_v33  ;;  %v2696_v34 = vpop.f32.mrb[7].mxu1 }
 0x15e   : > { %v738_v35 = vadd.f32 %v737_v32, %v701_v26  ;;  %v2703_v36 = vpop.f32.mrb[9].mxu0 }
 0x15f   : > { %v740_v37 = vpop.f32.mrb[10].mxu0  ;;  %v671_v38 = vpack.c.bf16 %v667_v1, %v667_v1 }
 0x160   : > { %v813_v18 = vpack.c.bf16 %v738_v35, %v738_v35  ;;  %v2704_v40 = vpop.f32.mrb[11].mxu0 }
 0x161   : > { %v2619_v41 = vld.sshfl [vmem:[#allocation2 + $0x4] sm:$0x33 pattern:$0x75316420]  ;;  %673 = vst.msk [vmem:[#allocation3 + $0x4] sm:$0xf] %vm525_vm2, %v671_v38 }
 0x162   : > { %815 = vst.msk [vmem:[#allocation2 + $0x8] sm:$0xf] %vm525_vm2, %v813_v18  ;;  %v1361_v42 = vrot.slane %v2619_v41, %v3125_v39  ;;  %v1354_v43 = vcombine.high %v2619_v41, %v2619_v41  ;;  %v806_v45 = vpop.f32.mrb[8].mxu1 }
 0x163   : > { %v807_v20 = vadd.f32 %v806_v45, %v770_v17  ;;  %v2711_v47 = vpop.f32.mrb[9].mxu1 }
 0x164   : > { %v2620_v48 = vpack.i.b16 %v1361_v42, %v1361_v42  ;;  %v1372_v49 = vunpack.i.h.s16 %v1361_v42  ;;  %v3185_v50 = vrot.slane %v1354_v43, %v3125_v39  ;;  %v809_v52 = vpop.f32.mrb[10].mxu1  ;;  %v1369_v53 = vcombine.high %v1361_v42, %v1361_v42 }
 0x165   : > { %v882_v51 = vpop.f32.mrb[12].mxu0  ;;  %v812_v54 = vadd.f32 %v807_v20, %v3119_v33  ;;  %v2712_v56 = vpop.f32.mrb[11].mxu1 }
 0x166   : > { %v883_v55 = vadd.f32 %v882_v51, %v846_v46  ;;  %v2719_v57 = vpop.f32.mrb[13].mxu0  ;;  %v1390_v58 = vrot.slane %v2620_v48, %v3055_v25  ;;  %v1380_v59 = vpack.i.b16 %v1372_v49, %v1372_v49  ;;  %v1374_v61 = vunpack.i.h.s16 %v3185_v50  ;;  %v3217_v52 = vpop.permute.xlu1 %1210 }
 0x167   : > { %v885_v60 = vpop.f32.mrb[14].mxu0  ;;  %v2621_v62 = vpack.i.b16 %v3185_v50, %v3185_v50  ;;  %v1376_v63 = vunpack.i.h.s16 %v1369_v53  ;;  %v2622_v0 = vpack.i.b16 %v1369_v53, %v1369_v53  ;;  %v816_v2 = vpack.c.bf16 %v812_v54, %v812_v54  ;;  %v3223_v56 = vpop.permute.xlu0 %1217 }
 0x168   : > { %v958_v3 = vpack.c.bf16 %v883_v55, %v883_v55  ;;  %v2720_v4 = vpop.f32.mrb[15].mxu0  ;;  %v1420_v5 = vpack.i.b16 %v1390_v58, %v1390_v58  ;;  %v1394_v6 = vrot.slane %v1380_v59, %v3055_v25  ;;  %v3193_v7 = vld [vmem:[#allocation3 + $0x4] sm:$0xf]  ;;  %v1382_v9 = vpack.i.b16 %v1374_v61, %v1374_v61 }
 0x169   : > { %v2626_v8 = vld.sshfl [vmem:[#allocation2 + $0x8] sm:$0x33 pattern:$0x75316420]  ;;  %v1398_v10 = vrot.slane %v2621_v62, %v3055_v25  ;;  %v1384_v12 = vpack.i.b16 %v1376_v63, %v1376_v63  ;;  %v1406_v13 = vrot.slane %v2622_v0, %v3055_v25  ;;  %818 = vst.msk [vmem:[#allocation3 + $0x8] sm:$0xf] %vm525_vm2, %v816_v2 }
 0x16a   : > { %960 = vst.msk [vmem:[#allocation2 + $0xc] sm:$0xf] %vm525_vm2, %v958_v3  ;;  %v1425_v14 = vrot.slane %v1420_v5, %v3055_v25  ;;  %v1726_v15 = vcombine.high %v2626_v8, %v2626_v8  ;;  %v1733_v16 = vrot.slane %v2626_v8, %v3125_v39  ;;  %v1427_v17 = vpack.i.b16 %v1394_v6, %v1394_v6  ;;  %v951_v23 = vpop.f32.mrb[12].mxu1 }
 0x16b   : > { %v1402_v24 = vrot.slane %v1382_v9, %v3055_v25  ;;  %v1434_v26 = vpack.i.b16 %v1398_v10, %v1398_v10  ;;  %v1410_v27 = vrot.slane %v1384_v12, %v3055_v25  ;;  %v1448_v29 = vpack.i.b16 %v1406_v13, %v1406_v13  ;;  %v2727_v32 = vpop.f32.mrb[13].mxu1 }
 0x16c   : > { %v952_v31 = vadd.f32 %v951_v23, %v3176_v28  ;;  %v1475_v1 = vadd.bf16 %v1425_v14, %v3193_v7  ;;  %v2627_v34 = vpack.i.b16 %v1733_v16, %v1733_v16  ;;  %v1432_v35 = vrot.slane %v1427_v17, %v3055_v25  ;;  %v954_v36 = vpop.f32.mrb[14].mxu1  ;;  %v3236_v14 = vpop.permute.xlu1 %1224 }
 0x16d   : > { %v1744_v37 = vunpack.i.h.s16 %v1733_v16  ;;  %v1441_v38 = vpack.i.b16 %v1402_v24, %v1402_v24  ;;  %v1740_v18 = vrot.slane %v1726_v15, %v3125_v39  ;;  %v1439_v40 = vrot.slane %v1434_v26, %v3055_v25  ;;  %v2728_v42 = vpop.f32.mrb[15].mxu1  ;;  %v3241_v23 = vpop.permute.xlu0 %1231 }
 0x16e   : > { %v957_v41 = vadd.f32 %v952_v31, %v3119_v33  ;;  %2794 = vtanh.bf16 %v1475_v1  ;;  %v1762_v43 = vrot.slane %v2627_v34, %v3055_v25  ;;  %v1476_v28 = vadd.bf16 %v1432_v35, %v3193_v7 }
 0x16f   : > { %v1752_v45 = vpack.i.b16 %v1744_v37, %v1744_v37  ;;  %v1446_v46 = vrot.slane %v1441_v38, %v3055_v25  ;;  %v1746_v20 = vunpack.i.h.s16 %v1740_v18  ;;  %v1477_v47 = vadd.bf16 %v1439_v40, %v3193_v7 }
 0x170   : > { %v961_v48 = vpack.c.bf16 %v957_v41, %v957_v41  ;;  %v1792_v49 = vpack.i.b16 %v1762_v43, %v1762_v43  ;;  %2796 = vtanh.bf16 %v1476_v28  ;;  %v2628_v51 = vpack.i.b16 %v1740_v18, %v1740_v18  ;;  %v3219_v53 = vld [vmem:[#allocation3 + $0x8] sm:$0xf] }
 0x171   : > { %v1766_v33 = vrot.slane %v1752_v45, %v3055_v25  ;;  %v1478_v54 = vadd.bf16 %v1446_v46, %v3193_v7  ;;  %v1754_v55 = vpack.i.b16 %v1746_v20, %v1746_v20  ;;  %2798 = vtanh.bf16 %v1477_v47  ;;  %v3251_v46 = vpop.permute.xlu1 %1238 }
 0x172   : > { %963 = vst.msk [vmem:[#allocation3 + $0xc] sm:$0xf] %vm525_vm2, %v961_v48  ;;  %v1797_v57 = vrot.slane %v1792_v49, %v3055_v25  ;;  %v1770_v58 = vrot.slane %v2628_v51, %v3055_v25  ;;  %v1455_v59 = vpack.i.b16 %v1410_v27, %v1410_v27  ;;  %v1741_v60 = vcombine.high %v1733_v16, %v1733_v16  ;;  %v3255_v51 = vpop.permute.xlu0 %1562 }
 0x173   : > { %v1799_v61 = vpack.i.b16 %v1766_v33, %v1766_v33  ;;  %2800 = vtanh.bf16 %v1478_v54  ;;  %v1774_v62 = vrot.slane %v1754_v55, %v3055_v25  ;;  %v1453_v63 = vrot.slane %v1448_v29, %v3055_v25 }
 0x174   : > { %v1847_v0 = vadd.bf16 %v1797_v57, %v3219_v53  ;;  %v1806_v2 = vpack.i.b16 %v1770_v58, %v1770_v58  ;;  %v1460_v3 = vrot.slane %v1455_v59, %v3055_v25  ;;  %v1748_v4 = vunpack.i.h.s16 %v1741_v60  ;;  %v3261_v58 = vld.sshfl [vmem:[#allocation2 + $0xc] sm:$0x33 pattern:$0x75316420] }
 0x175   : > { %v1804_v5 = vrot.slane %v1799_v61, %v3055_v25  ;;  %v1813_v6 = vpack.i.b16 %v1774_v62, %v1774_v62  ;;  %v1479_v8 = vadd.bf16 %v1453_v63, %v3193_v7  ;;  %v2629_v9 = vpack.i.b16 %v1741_v60, %v1741_v60 }
 0x176   : > { %2802 = vtanh.bf16 %v1847_v0  ;;  %v1811_v10 = vrot.slane %v1806_v2, %v3055_v25  ;;  %v1480_v12 = vadd.bf16 %v1460_v3, %v3193_v7  ;;  %v1756_v13 = vpack.i.b16 %v1748_v4, %v1748_v4 }
 0x177   : > { %v1848_v15 = vadd.bf16 %v1804_v5, %v3219_v53  ;;  %v1818_v16 = vrot.slane %v1813_v6, %v3055_v25  ;;  %2804 = vtanh.bf16 %v1479_v8  ;;  %v1778_v17 = vrot.slane %v2629_v9, %v3055_v25 }
 0x178   : > { %v1849_v24 = vadd.bf16 %v1811_v10, %v3219_v53  ;;  %2806 = vtanh.bf16 %v1480_v12  ;;  %v1782_v26 = vrot.slane %v1756_v13, %v3055_v25  ;;  %v1370_v27 = vcombine.high %v3185_v50, %v3185_v50 }
 0x179   : > { %v2795_v29 = vpop.eup %2794  ;;  %2808 = vtanh.bf16 %v1848_v15  ;;  %v1850_v31 = vadd.bf16 %v1818_v16, %v3219_v53  ;;  %v1820_v32 = vpack.i.b16 %v1778_v17, %v1778_v17  ;;  %v1742_v1 = vcombine.high %v1740_v18, %v1740_v18  ;;  %v3275_v16 = vpop.permute.xlu1 %1570 }
 0x17a   : > { %v1491_v34 = vunpack.c.l.bf16 %v2795_v29  ;;  %2810 = vtanh.bf16 %v1849_v24  ;;  %v1827_v35 = vpack.i.b16 %v1782_v26, %v1782_v26  ;;  %v1378_v36 = vunpack.i.h.s16 %v1370_v27 }
 0x17b   : > { %v2797_v37 = vpop.eup %2796  ;;  %2812 = vtanh.bf16 %v1850_v31  ;;  %v1825_v38 = vrot.slane %v1820_v32, %v3055_v25  ;;  %v1750_v40 = vunpack.i.h.s16 %v1742_v1  ;;  %v2623_v41 = vpack.i.b16 %v1370_v27, %v1370_v27  ;;  %v3279_v31 = vpop.permute.xlu0 %1586 }
 0x17c   : > { %v2799_v42 = vpop.eup %2798  ;;  %v1505_v43 = vmul.f32 %v3149_v11, %v1491_v34  ;;  %v1492_v50 = vunpack.c.l.bf16 %v2797_v37  ;;  %v1832_v28 = vrot.slane %v1827_v35, %v3055_v25  ;;  %v1386_v45 = vpack.i.b16 %v1378_v36, %v1378_v36 }
 0x17d   : > { %v1493_v18 = vunpack.c.l.bf16 %v2799_v42  ;;  %v1851_v20 = vadd.bf16 %v1825_v38, %v3219_v53  ;;  %v1758_v47 = vpack.i.b16 %v1750_v40, %v1750_v40  ;;  %v1414_v48 = vrot.slane %v2623_v41, %v3055_v25 }
 0x17e   : > { %v2801_v49 = vpop.eup %2800  ;;  %1513 = vst.msk [vmem:[#allocation4] sm:$0xff] %vm416_vm1, %v1505_v43  ;;  %v1506_v33 = vmul.f32 %v3149_v11, %v1492_v50  ;;  %v1852_v54 = vadd.bf16 %v1832_v28, %v3219_v53  ;;  %v1418_v55 = vrot.slane %v1386_v45, %v3055_v25  ;;  %v2630_v57 = vpack.i.b16 %v1742_v1, %v1742_v1 }
 0x17f   : > { %v1494_v59 = vunpack.c.l.bf16 %v2801_v49  ;;  %v1507_v60 = vmul.f32 %v3149_v11, %v1493_v18  ;;  %2814 = vtanh.bf16 %v1851_v20  ;;  %v1790_v61 = vrot.slane %v1758_v47, %v3055_v25 }
 0x180   : > { %1514 = vst.msk [vmem:[#allocation4 + $0x8] sm:$0xff] %vm416_vm1, %v1506_v33  ;;  %2816 = vtanh.bf16 %v1852_v54  ;;  %v1469_v62 = vpack.i.b16 %v1418_v55, %v1418_v55  ;;  %v1462_v63 = vpack.i.b16 %v1414_v48, %v1414_v48  ;;  %v1786_v0 = vrot.slane %v2630_v57, %v3055_v25  ;;  %v3297_v55 = vpop.permute.xlu1 %1578 }
 0x181   : > { %v2803_v2 = vpop.eup %2802  ;;  %v1508_v3 = vmul.f32 %v3149_v11, %v1494_v59  ;;  %1515 = vst.msk [vmem:[#allocation4 + $0x10] sm:$0xff] %vm416_vm1, %v1507_v60  ;;  %v1841_v4 = vpack.i.b16 %v1790_v61, %v1790_v61  ;;  %v2098_v5 = vcombine.high %v3261_v58, %v3261_v58  ;;  %v2105_v6 = vrot.slane %v3261_v58, %v3125_v39 }
 0x182   : > { %v2805_v8 = vpop.eup %2804  ;;  %v1863_v9 = vunpack.c.l.bf16 %v2803_v2  ;;  %v1474_v10 = vrot.slane %v1469_v62, %v3055_v25  ;;  %v1467_v12 = vrot.slane %v1462_v63, %v3055_v25  ;;  %v1834_v13 = vpack.i.b16 %v1786_v0, %v1786_v0 }
 0x183   : > { %v2807_v15 = vpop.eup %2806  ;;  %1516 = vst.msk [vmem:[#allocation4 + $0x18] sm:$0xff] %vm416_vm1, %v1508_v3  ;;  %v1495_v17 = vunpack.c.l.bf16 %v2805_v8  ;;  %v1846_v24 = vrot.slane %v1841_v4, %v3055_v25  ;;  %v2634_v26 = vpack.i.b16 %v2105_v6, %v2105_v6  ;;  %v2116_v27 = vunpack.i.h.s16 %v2105_v6  ;;  %v3310_v8 = vld [vmem:[#allocation3 + $0xc] sm:$0xf] }
 0x184   : > { %v2809_v29 = vpop.eup %2808  ;;  %v1877_v32 = vmul.f32 %v3149_v11, %v1863_v9  ;;  %v1496_v1 = vunpack.c.l.bf16 %v2807_v15  ;;  %v1482_v34 = vadd.bf16 %v1474_v10, %v3193_v7  ;;  %v1481_v35 = vadd.bf16 %v1467_v12, %v3193_v7 }
 0x185   : > { %v2811_v36 = vpop.eup %2810  ;;  %v1521_v37 = vld [vmem:[#allocation4] sm:$0xff]  ;;  %v1864_v38 = vunpack.c.l.bf16 %v2809_v29  ;;  %v1509_v40 = vmul.f32 %v3149_v11, %v1495_v17  ;;  %v1854_v41 = vadd.bf16 %v1846_v24, %v3219_v53  ;;  %v1839_v42 = vrot.slane %v1834_v13, %v3055_v25 }
 0x186   : > { %v2813_v43 = vpop.eup %2812  ;;  %v1529_v50 = vsel %vm416_vm1, %v1521_v37, 0.0  ;;  %1885 = vst.msk [vmem:[#allocation4] sm:$0xff] %vm416_vm1, %v1877_v32  ;;  %v1865_v28 = vunpack.c.l.bf16 %v2811_v36  ;;  %v1510_v45 = vmul.f32 %v3149_v11, %v1496_v1  ;;  %2818 = vtanh.bf16 %v1482_v34  ;;  %v3320_v32 = vpop.permute.xlu1 %1594 }
 0x187   : > { %1530 = vadd.xlane.f32.xlu1 %v1529_v50  ;;  %v1522_v7 = vld [vmem:[#allocation4 + $0x8] sm:$0xff]  ;;  %v1878_v18 = vmul.f32 %v3149_v11, %v1864_v38  ;;  %v1866_v20 = vunpack.c.l.bf16 %v2813_v43  ;;  %1517 = vst.msk [vmem:[#allocation4 + $0x20] sm:$0xff] %vm416_vm1, %v1509_v40  ;;  %2820 = vtanh.bf16 %v1854_v41  ;;  %v1853_v47 = vadd.bf16 %v1839_v42, %v3219_v53  ;;  %v3301_v53 = vpop.permute.xlu0 %1602 }
 0x188   : > { %v1532_v48 = vsel %vm416_vm1, %v1522_v7, 0.0  ;;  %v1523_v49 = vld [vmem:[#allocation4 + $0x10] sm:$0xff]  ;;  %v1879_v33 = vmul.f32 %v3149_v11, %v1865_v28  ;;  %1518 = vst.msk [vmem:[#allocation4 + $0x28] sm:$0xff] %vm416_vm1, %v1510_v45  ;;  %2822 = vtanh.bf16 %v1481_v35  ;;  %v2134_v54 = vrot.slane %v2634_v26, %v3055_v25 }
 0x189   : > { %1533 = vadd.xlane.f32.xlu0 %v1532_v48  ;;  %1886 = vst.msk [vmem:[#allocation4 + $0x8] sm:$0xff] %vm416_vm1, %v1878_v18  ;;  %v1880_v57 = vmul.f32 %v3149_v11, %v1866_v20  ;;  %v2124_v58 = vpack.i.b16 %v2116_v27, %v2116_v27  ;;  %2824 = vtanh.bf16 %v1853_v47  ;;  %v3305_v62 = vrot.slane %v2098_v5, %v3125_v39 }
 0x18a   : > { %v2815_v59 = vpop.eup %2814  ;;  %v1524_v60 = vld [vmem:[#allocation4 + $0x18] sm:$0xff]  ;;  %1887 = vst.msk [vmem:[#allocation4 + $0x10] sm:$0xff] %vm416_vm1, %v1879_v33  ;;  %v2164_v61 = vpack.i.b16 %v2134_v54, %v2134_v54  ;;  %v2113_v63 = vcombine.high %v2105_v6, %v2105_v6  ;;  %v1535_v3 = vsel %vm416_vm1, %v1523_v49, 0.0 }
 0x18b   : > { %v2817_v0 = vpop.eup %2816  ;;  %v1538_v2 = vsel %vm416_vm1, %v1524_v60, 0.0  ;;  %1888 = vst.msk [vmem:[#allocation4 + $0x18] sm:$0xff] %vm416_vm1, %v1880_v57  ;;  %v1867_v4 = vunpack.c.l.bf16 %v2815_v59  ;;  %v2138_v9 = vrot.slane %v2124_v58, %v3055_v25  ;;  %v2118_v39 = vunpack.i.h.s16 %v3305_v62  ;;  %v3326_v38 = vpop.permute.xlu0 %1618 }
 0x18c   : > { %1539 = vadd.xlane.f32.xlu1 %v1538_v2  ;;  %v1868_v10 = vunpack.c.l.bf16 %v2817_v0  ;;  %v2169_v12 = vrot.slane %v2164_v61, %v3055_v25  ;;  %v2635_v5 = vpack.i.b16 %v3305_v62, %v3305_v62  ;;  %v2120_v15 = vunpack.i.h.s16 %v2113_v63  ;;  %v3337_v60 = vpop.permute.xlu1 %1610 }
 0x18d   : > { %1536 = vadd.xlane.f32.xlu0 %v1535_v3  ;;  %v1881_v6 = vmul.f32 %v3149_v11, %v1867_v4  ;;  %v2171_v13 = vpack.i.b16 %v2138_v9, %v2138_v9  ;;  %v2636_v17 = vpack.i.b16 %v2113_v63, %v2113_v63  ;;  %v2126_v29 = vpack.i.b16 %v2118_v39, %v2118_v39 }
 0x18e   : > { %v1882_v24 = vmul.f32 %v3149_v11, %v1868_v10  ;;  %v1525_v26 = vld [vmem:[#allocation4 + $0x20] sm:$0xff]  ;;  %v2219_v27 = vadd.bf16 %v2169_v12, %v3310_v8  ;;  %v2142_v36 = vrot.slane %v2635_v5, %v3055_v25  ;;  %v2128_v37 = vpack.i.b16 %v2120_v15, %v2120_v15 }
 0x18f   : > { %v1526_v1 = vld [vmem:[#allocation4 + $0x28] sm:$0xff]  ;;  %v1541_v34 = vsel %vm416_vm1, %v1525_v26, 0.0  ;;  %1889 = vst.msk [vmem:[#allocation4 + $0x20] sm:$0xff] %vm416_vm1, %v1881_v6  ;;  %v2176_v35 = vrot.slane %v2171_v13, %v3055_v25  ;;  %v2146_v41 = vrot.slane %v2126_v29, %v3055_v25  ;;  %v2150_v42 = vrot.slane %v2636_v17, %v3055_v25  ;;  %v3341_v2 = vpop.permute.xlu0 %1934 }
 0x190   : > { %v1544_v40 = vsel %vm416_vm1, %v1526_v1, 0.0  ;;  %1890 = vst.msk [vmem:[#allocation4 + $0x28] sm:$0xff] %vm416_vm1, %v1882_v24  ;;  %2826 = vtanh.bf16 %v2219_v27  ;;  %v2178_v28 = vpack.i.b16 %v2142_v36, %v2142_v36  ;;  %v2154_v45 = vrot.slane %v2128_v37, %v3055_v25  ;;  %v3354_v26 = vpop.permute.xlu1 %1942  ;;  %v1893_v36 = vld [vmem:[#allocation4] sm:$0xff] }
 0x191   : > { %v2819_v43 = vpop.eup %2818  ;;  %1545 = vadd.xlane.f32.xlu1 %v1544_v40  ;;  %1542 = vadd.xlane.f32.xlu0 %v1541_v34  ;;  %v2220_v50 = vadd.bf16 %v2176_v35, %v3310_v8  ;;  %v2185_v20 = vpack.i.b16 %v2146_v41, %v2146_v41  ;;  %v2192_v47 = vpack.i.b16 %v2150_v42, %v2150_v42 }
 0x192   : > { %v2821_v7 = vpop.eup %2820  ;;  %v1498_v18 = vunpack.c.l.bf16 %v2819_v43  ;;  %v2183_v49 = vrot.slane %v2178_v28, %v3055_v25  ;;  %v2199_v58 = vpack.i.b16 %v2154_v45, %v2154_v45  ;;  %v2114_v10 = vcombine.high %v3305_v62, %v3305_v62  ;;  %v1894_v28 = vld [vmem:[#allocation4 + $0x8] sm:$0xff] }
 0x193   : > { %v2823_v48 = vpop.eup %2822  ;;  %2828 = vtanh.bf16 %v2220_v50  ;;  %v2190_v57 = vrot.slane %v2185_v20, %v3055_v25  ;;  %v1870_v61 = vunpack.c.l.bf16 %v2821_v7  ;;  %v2197_v0 = vrot.slane %v2192_v47, %v3055_v25  ;;  %v3356_v27 = vpop.permute.xlu0 %2306 }
 0x194   : > { %v1512_v33 = vmul.f32 %v3149_v11, %v1498_v18  ;;  %v1497_v54 = vunpack.c.l.bf16 %v2823_v48  ;;  %v2825_v59 = vpop.eup %2824  ;;  %v2221_v63 = vadd.bf16 %v2183_v49, %v3310_v8  ;;  %v2204_v9 = vrot.slane %v2199_v58, %v3055_v25  ;;  %v3369_v48 = vpop.permute.xlu1 %1950 }
 0x195   : > { %v2222_v4 = vadd.bf16 %v2190_v57, %v3310_v8  ;;  %v2223_v12 = vadd.bf16 %v2197_v0, %v3310_v8  ;;  %v1869_v39 = vunpack.c.l.bf16 %v2825_v59  ;;  %v2637_v6 = vpack.i.b16 %v2114_v10, %v2114_v10 }
 0x196   : > { %1520 = vst.msk [vmem:[#allocation4 + $0x38] sm:$0xff] %vm416_vm1, %v1512_v33  ;;  %v1511_v3 = vmul.f32 %v3149_v11, %v1497_v54  ;;  %2830 = vtanh.bf16 %v2221_v63  ;;  %v2224_v5 = vadd.bf16 %v2204_v9, %v3310_v8  ;;  %v2122_v13 = vunpack.i.h.s16 %v2114_v10  ;;  %v1895_v10 = vld [vmem:[#allocation4 + $0x10] sm:$0xff] }
 0x197   : > { %2832 = vtanh.bf16 %v2222_v4  ;;  %v1884_v15 = vmul.f32 %v3149_v11, %v1870_v61  ;;  %v2158_v17 = vrot.slane %v2637_v6, %v3055_v25  ;;  %v1883_v29 = vmul.f32 %v3149_v11, %v1869_v39  ;;  %v3373_v57 = vpop.permute.xlu0 %1958  ;;  %v1896_v61 = vld [vmem:[#allocation4 + $0x18] sm:$0xff] }
 0x198   : > { %1519 = vst.msk [vmem:[#allocation4 + $0x30] sm:$0xff] %vm416_vm1, %v1511_v3  ;;  %2834 = vtanh.bf16 %v2223_v12  ;;  %v2130_v62 = vpack.i.b16 %v2122_v13, %v2122_v13  ;;  %v1901_v20 = vsel %vm416_vm1, %v1893_v36, 0.0  ;;  %v1904_v58 = vsel %vm416_vm1, %v1894_v28, 0.0  ;;  %v3381_v13 = vpop.permute.xlu1 %2314 }
 0x199   : > { %2836 = vtanh.bf16 %v2224_v5  ;;  %v2206_v34 = vpack.i.b16 %v2158_v17, %v2158_v17  ;;  %v1910_v39 = vsel %vm416_vm1, %v1896_v61, 0.0 }
 0x19a   : > { %v2162_v37 = vrot.slane %v2130_v62, %v3055_v25 }
 0x19b   : > { %v2827_v24 = vpop.eup %2826  ;;  %v2211_v43 = vrot.slane %v2206_v34, %v3055_v25  ;;  %v3385_v17 = vpop.permute.xlu0 %1966 }
 0x19c   : > { %v2235_v1 = vunpack.c.l.bf16 %v2827_v24  ;;  %v2213_v7 = vpack.i.b16 %v2162_v37, %v2162_v37  ;;  %v1907_v24 = vsel %vm416_vm1, %v1895_v10, 0.0 }
 0x19d   : > { %v1528_v35 = vld [vmem:[#allocation4 + $0x38] sm:$0xff]  ;;  %v2225_v47 = vadd.bf16 %v2211_v43, %v3310_v8 }
 0x19e   : > { %v2829_v40 = vpop.eup %2828  ;;  %v1550_v41 = vsel %vm416_vm1, %v1528_v35, 0.0  ;;  %1892 = vst.msk [vmem:[#allocation4 + $0x38] sm:$0xff] %vm416_vm1, %v1884_v15  ;;  %v2249_v42 = vmul.f32 %v3149_v11, %v2235_v1  ;;  %v2218_v33 = vrot.slane %v2213_v7, %v3055_v25 }
 0x19f   : > { %1551 = vadd.xlane.f32.xlu1 %v1550_v41  ;;  %v1527_v50 = vld [vmem:[#allocation4 + $0x30] sm:$0xff]  ;;  %v2236_v45 = vunpack.c.l.bf16 %v2829_v40  ;;  %2838 = vtanh.bf16 %v2225_v47  ;;  %v3394_v40 = vpop.permute.xlu1 %2322  ;;  %v3396_v41 = vpop.permute.xlu0 %1974 }
 0x1a0   : > { %v1547_v18 = vsel %vm416_vm1, %v1527_v50, 0.0  ;;  %1891 = vst.msk [vmem:[#allocation4 + $0x30] sm:$0xff] %vm416_vm1, %v1883_v29  ;;  %2257 = vst.msk [vmem:[#allocation4] sm:$0xff] %vm416_vm1, %v2249_v42  ;;  %v2226_v0 = vadd.bf16 %v2218_v33, %v3310_v8  ;;  %v1898_v8 = vld [vmem:[#allocation4 + $0x28] sm:$0xff]  ;;  %v1897_v29 = vld [vmem:[#allocation4 + $0x20] sm:$0xff] }
 0x1a1   : > { %1548 = vadd.xlane.f32.xlu0 %v1547_v18  ;;  %v2250_v49 = vmul.f32 %v3149_v11, %v2236_v45  ;;  %v2831_v54 = vpop.eup %2830  ;;  %v1916_v1 = vsel %vm416_vm1, %v1898_v8, 0.0  ;;  %v1913_v36 = vsel %vm416_vm1, %v1897_v29, 0.0 }
 0x1a2   : > { %v2833_v59 = vpop.eup %2832  ;;  %v2237_v63 = vunpack.c.l.bf16 %v2831_v54  ;;  %2840 = vtanh.bf16 %v2226_v0 }
 0x1a3   : > { %1902 = vadd.xlane.f32.xlu1 %v1901_v20  ;;  %2258 = vst.msk [vmem:[#allocation4 + $0x8] sm:$0xff] %vm416_vm1, %v2250_v49  ;;  %v2835_v3 = vpop.eup %2834  ;;  %v2238_v4 = vunpack.c.l.bf16 %v2833_v59  ;;  %v3403_v49 = vpop.permute.xlu1 %2330 }
 0x1a4   : > { %v2837_v9 = vpop.eup %2836  ;;  %v2251_v25 = vmul.f32 %v3149_v11, %v2237_v63  ;;  %v2239_v12 = vunpack.c.l.bf16 %v2835_v3 }
 0x1a5   : > { %1905 = vadd.xlane.f32.xlu0 %v1904_v58  ;;  %v2252_v5 = vmul.f32 %v3149_v11, %v2238_v4  ;;  %v2240_v6 = vunpack.c.l.bf16 %v2837_v9  ;;  %v1900_v28 = vld [vmem:[#allocation4 + $0x38] sm:$0xff]  ;;  %v3406_v58 = vpop.permute.xlu0 %1982 }
 0x1a6   : > { %2259 = vst.msk [vmem:[#allocation4 + $0x10] sm:$0xff] %vm416_vm1, %v2251_v25  ;;  %v2253_v15 = vmul.f32 %v3149_v11, %v2239_v12  ;;  %v1922_v47 = vsel %vm416_vm1, %v1900_v28, 0.0 }
 0x1a7   : > { %1911 = vadd.xlane.f32.xlu1 %v1910_v39  ;;  %2260 = vst.msk [vmem:[#allocation4 + $0x18] sm:$0xff] %vm416_vm1, %v2252_v5  ;;  %v2254_v62 = vmul.f32 %v3149_v11, %v2240_v6  ;;  %v1899_v34 = vld [vmem:[#allocation4 + $0x30] sm:$0xff]  ;;  %v2265_v35 = vld [vmem:[#allocation4] sm:$0xff]  ;;  %v3412_v4 = vpop.permute.xlu1 %2338 }
 0x1a8   : > { %2261 = vst.msk [vmem:[#allocation4 + $0x20] sm:$0xff] %vm416_vm1, %v2253_v15  ;;  %v1919_v42 = vsel %vm416_vm1, %v1899_v34, 0.0  ;;  %v2273_v50 = vsel %vm416_vm1, %v2265_v35, 0.0 }
 0x1a9   : > { %1908 = vadd.xlane.f32.xlu0 %v1907_v24  ;;  %2262 = vst.msk [vmem:[#allocation4 + $0x28] sm:$0xff] %vm416_vm1, %v2254_v62 }
 0x1aa   : > { %v2839_v37 = vpop.eup %2838  ;;  %v2266_v54 = vld [vmem:[#allocation4 + $0x8] sm:$0xff] }
 0x1ab   : > { %1917 = vadd.xlane.f32.xlu1 %v1916_v1  ;;  %v2241_v43 = vunpack.c.l.bf16 %v2839_v37  ;;  %v2276_v63 = vsel %vm416_vm1, %v2266_v54, 0.0  ;;  %v3419_v6 = vpop.permute.xlu1 %2346 }
 0x1ad   : > { %1914 = vadd.xlane.f32.xlu0 %v1913_v36  ;;  %v2841_v45 = vpop.eup %2840  ;;  %v2255_v7 = vmul.f32 %v3149_v11, %v2241_v43  ;;  %v2267_v20 = vld [vmem:[#allocation4 + $0x10] sm:$0xff] }
 0x1ae   : > { %v2242_v18 = vunpack.c.l.bf16 %v2841_v45  ;;  %v2279_v59 = vsel %vm416_vm1, %v2267_v20, 0.0  ;;  %v2268_v0 = vld [vmem:[#allocation4 + $0x18] sm:$0xff] }
 0x1af   : > { %1920 = vadd.xlane.f32.xlu1 %v1919_v42  ;;  %2263 = vst.msk [vmem:[#allocation4 + $0x30] sm:$0xff] %vm416_vm1, %v2255_v7  ;;  %v2269_v61 = vld [vmem:[#allocation4 + $0x20] sm:$0xff]  ;;  %v2282_v10 = vsel %vm416_vm1, %v2268_v0, 0.0  ;;  %v3424_v24 = vpop.permute.xlu1 %2354 }
 0x1b0   : > { %v2256_v33 = vmul.f32 %v3149_v11, %v2242_v18  ;;  %v2285_v3 = vsel %vm416_vm1, %v2269_v61, 0.0  ;;  %v2270_v9 = vld [vmem:[#allocation4 + $0x28] sm:$0xff]  ;;  %v3414_v11 = vpop.permute.xlu0 %1990 }
 0x1b1   : > { %2274 = vadd.xlane.f32.xlu0 %v2273_v50  ;;  %v2288_v25 = vsel %vm416_vm1, %v2270_v9, 0.0 }
 0x1b2   : > { %2264 = vst.msk [vmem:[#allocation4 + $0x38] sm:$0xff] %vm416_vm1, %v2256_v33 }
 0x1b3   : > { %1923 = vadd.xlane.f32.xlu1 %v1922_v47  ;;  %v1162_v29 = vpop.xlane.xlu1 %1161 }
 0x1b4   : > { %v3421_v8 = vpop.permute.xlu0 %2362  ;;  %v1249_v34 = vadd.f32 %v3205_v30, %v1162_v29 }
 0x1b5   : > { %2280 = vadd.xlane.f32.xlu0 %v2279_v59 }
 0x1b6   : > { %v2271_v39 = vld [vmem:[#allocation4 + $0x30] sm:$0xff] }
 0x1b7   : > { %2277 = vadd.xlane.f32.xlu1 %v2276_v63  ;;  %v2291_v15 = vsel %vm416_vm1, %v2271_v39, 0.0  ;;  %v1171_v35 = vpop.xlane.xlu1 %1170 }
 0x1b8   : > { %v1159_v62 = vpop.xlane.xlu0 %1158  ;;  %v1252_v43 = vadd.f32 %v3223_v56, %v1171_v35 }
 0x1b9   : > { %2286 = vadd.xlane.f32.xlu0 %v2285_v3  ;;  %v2272_v12 = vld [vmem:[#allocation4 + $0x38] sm:$0xff]  ;;  %v1248_v42 = vadd.f32 %v3182_v44, %v1159_v62 }
 0x1ba   : > { %v2294_v5 = vsel %vm416_vm1, %v2272_v12, 0.0 }
 0x1bb   : > { %2283 = vadd.xlane.f32.xlu1 %v2282_v10  ;;  %v1177_v50 = vpop.xlane.xlu1 %1176 }
 0x1bc   : > { %v1165_v1 = vpop.xlane.xlu0 %1164  ;;  %v1254_v7 = vadd.f32 %v3241_v23, %v1177_v50 }
 0x1bd   : > { %2289 = vadd.xlane.f32.xlu0 %v2288_v25  ;;  %v1250_v36 = vadd.f32 %v3201_v22, %v1165_v1 }
 0x1bf   : > { %2295 = vadd.xlane.f32.xlu1 %v2294_v5 }
 0x1c0   : > { %v1168_v37 = vpop.xlane.xlu0 %1167 }
 0x1c1   : > { %2292 = vadd.xlane.f32.xlu0 %v2291_v15  ;;  %v1251_v45 = vadd.f32 %v3217_v52, %v1168_v37 }
 0x1c4   : > { %v1174_v28 = vpop.xlane.xlu0 %1173 }
 0x1c5   : > { %v1253_v30 = vadd.f32 %v3236_v14, %v1174_v28 }
 0x1c8   : > { %v1180_v18 = vpop.xlane.xlu0 %1179 }
 0x1c9   : > { %v1255_v22 = vadd.f32 %v3251_v46, %v1180_v18 }
 0x1d0   : > { %1268 = vperm.xlu1 %2761, %v1249_v34  }
 0x1d4   : > { %1271 = vperm.xlu1 %2761, %v1250_v36  }
 0x1d7   : > { %1265 = vperm.xlu0 %2760, %v1248_v42   ;;  %v3457_v42 = vand.u32 127, %v985_v19 }
 0x1d8   : > { %1277 = vperm.xlu1 %2761, %v1252_v43  }
 0x1db   : > { %1274 = vperm.xlu0 %2760, %v1251_v45  }
 0x1dc   : > { %1283 = vperm.xlu1 %2761, %v1254_v7  }
 0x1df   : > { %1280 = vperm.xlu0 %2760, %v1253_v30  }
 0x1e3   : > { %1286 = vperm.xlu0 %2760, %v1255_v22  }
 0x214   : > { %v1531_v44 = vpop.xlane.xlu1 %1530 }
 0x215   : > { %v1628_v56 = vadd.f32 %v3255_v51, %v1531_v44 }
 0x216   : > { %v1534_v20 = vpop.xlane.xlu0 %1533 }
 0x217   : > { %v1629_v47 = vadd.f32 %v3275_v16, %v1534_v20  ;;  %1645 = vperm.xlu1 %2761, %v1628_v56  }
 0x219   : > { %v1540_v33 = vpop.xlane.xlu1 %1539  ;;  %1648 = vperm.xlu0 %2760, %v1629_v47  }
 0x21a   : > { %v1537_v52 = vpop.xlane.xlu0 %1536  ;;  %v1631_v23 = vadd.f32 %v3279_v31, %v1540_v33 }
 0x21b   : > { %v1630_v54 = vadd.f32 %v3297_v55, %v1537_v52 }
 0x21d   : > { %1654 = vperm.xlu0 %2760, %v1631_v23   ;;  %1651 = vperm.xlu1 %2761, %v1630_v54  }
 0x21e   : > { %v1546_v14 = vpop.xlane.xlu1 %1545  ;;  %v1543_v59 = vpop.xlane.xlu0 %1542 }
 0x21f   : > { %v1633_v46 = vadd.f32 %v3301_v53, %v1546_v14  ;;  %v1632_v61 = vadd.f32 %v3320_v32, %v1543_v59 }
 0x221   : > { %1660 = vperm.xlu0 %2760, %v1633_v46   ;;  %1657 = vperm.xlu1 %2761, %v1632_v61  }
 0x22c   : > { %v1552_v51 = vpop.xlane.xlu1 %1551 }
 0x22d   : > { %v1635_v16 = vadd.f32 %v3326_v38, %v1552_v51  ;;  %v1668_v51 = vadd.s32 4294967288, %v3457_v42 }
 0x22e   : > { %v1549_v63 = vpop.xlane.xlu0 %1548 }
 0x22f   : > { %v1634_v0 = vadd.f32 %v3337_v60, %v1549_v63  ;;  %1666 = vperm.xlu0 %2760, %v1635_v16  }
 0x230   : > { %v1903_v31 = vpop.xlane.xlu1 %1902 }
 0x231   : > { %1663 = vperm.xlu1 %2761, %v1634_v0   ;;  %v2000_v3 = vadd.f32 %v3341_v2, %v1903_v31  ;;  %v1671_v0 = vsub.s32 %v1668_v51, %v3046_v21 }
 0x232   : > { %v1906_v55 = vpop.xlane.xlu0 %1905 }
 0x233   : > { %v2001_v9 = vadd.f32 %v3354_v26, %v1906_v55 }
 0x234   : > { %v1912_v10 = vpop.xlane.xlu1 %1911 }
 0x235   : > { %2020 = vperm.xlu0 %2760, %v2001_v9   ;;  %2017 = vperm.xlu1 %2761, %v2000_v3   ;;  %v2003_v5 = vadd.f32 %v3373_v57, %v1912_v10 }
 0x236   : > { %v1909_v53 = vpop.xlane.xlu0 %1908 }
 0x237   : > { %v2002_v32 = vadd.f32 %v3369_v48, %v1909_v53 }
 0x238   : > { %v1918_v25 = vpop.xlane.xlu1 %1917 }
 0x239   : > { %2023 = vperm.xlu1 %2761, %v2002_v32   ;;  %v2005_v62 = vadd.f32 %v3396_v41, %v1918_v25 }
 0x23a   : > { %v1915_v38 = vpop.xlane.xlu0 %1914 }
 0x23b   : > { %v2004_v12 = vadd.f32 %v3385_v17, %v1915_v38 }
 0x23c   : > { %v1921_v60 = vpop.xlane.xlu1 %1920 }
 0x23d   : > { %2029 = vperm.xlu0 %2760, %v2004_v12   ;;  %v2006_v17 = vadd.f32 %v3406_v58, %v1921_v60 }
 0x23e   : > { %v2275_v39 = vpop.xlane.xlu0 %2274 }
 0x23f   : > { %v2372_v2 = vadd.f32 %v3356_v27, %v2275_v39 }
 0x240   : > { %v1924_v15 = vpop.xlane.xlu1 %1923 }
 0x241   : > { %2026 = vperm.xlu0 %2760, %v2003_v5   ;;  %2389 = vperm.xlu1 %2761, %v2372_v2  }
 0x242   : > { %v2281_v26 = vpop.xlane.xlu0 %2280 }
 0x243   : > { %v2374_v48 = vadd.f32 %v3394_v40, %v2281_v26  ;;  %v2007_v40 = vadd.f32 %v3414_v11, %v1924_v15 }
 0x244   : > { %v2278_v29 = vpop.xlane.xlu1 %2277 }
 0x245   : > { %2032 = vperm.xlu0 %2760, %v2005_v62   ;;  %2395 = vperm.xlu1 %2761, %v2374_v48   ;;  %v2373_v57 = vadd.f32 %v3381_v13, %v2278_v29 }
 0x246   : > { %v2287_v1 = vpop.xlane.xlu0 %2286 }
 0x247   : > { %v2376_v34 = vadd.f32 %v3412_v4, %v2287_v1 }
 0x248   : > { %v2284_v35 = vpop.xlane.xlu1 %2283 }
 0x249   : > { %2035 = vperm.xlu0 %2760, %v2006_v17   ;;  %2401 = vperm.xlu1 %2761, %v2376_v34   ;;  %v2375_v36 = vadd.f32 %v3403_v49, %v2284_v35  ;;  %v1292_v49 = vsub.s32 %v3457_v42, %v3046_v21 }
 0x24a   : > { %v2290_v27 = vpop.xlane.xlu0 %2289 }
 0x24b   : > { %v2377_v41 = vadd.f32 %v3419_v6, %v2290_v27  ;;  %v2040_v27 = vadd.s32 4294967280, %v3457_v42 }
 0x24c   : > { %v2296_v37 = vpop.xlane.xlu1 %2295 }
 0x24d   : > { %2392 = vperm.xlu0 %2760, %v2373_v57   ;;  %2398 = vperm.xlu1 %2761, %v2375_v36   ;;  %v2379_v43 = vadd.f32 %v3421_v8, %v2296_v37  ;;  %v2043_v37 = vsub.s32 %v2040_v27, %v3046_v21 }
 0x24e   : > { %v2293_v58 = vpop.xlane.xlu0 %2292 }
 0x24f   : > { %v2378_v13 = vadd.f32 %v3424_v24, %v2293_v58  ;;  %v2412_v58 = vadd.s32 4294967272, %v3457_v42 }
 0x250   : > { %v1269_v4 = vpop.permute.xlu1 %1268 }
 0x251   : > { %2038 = vperm.xlu0 %2760, %v2007_v40   ;;  %2404 = vperm.xlu1 %2761, %v2377_v41   ;;  %v1297_v6 = vrot.slane %v1269_v4, %v1292_v49 }
 0x254   : > { %v1272_v50 = vpop.permute.xlu1 %1271 }
 0x255   : > { %2407 = vperm.xlu1 %2761, %v2378_v13   ;;  %2410 = vperm.xlu0 %2760, %v2379_v43   ;;  %v1301_v7 = vrot.slane %v1272_v50, %v1292_v49 }
 0x256   : > { %v1266_v11 = vpop.permute.xlu0 %1265 }
 0x257   : > { %v1293_v28 = vrot.slane %v1266_v11, %v1292_v49 }
 0x258   : > { %v1278_v45 = vpop.permute.xlu1 %1277 }
 0x259   : > { %v1323_v19 = vsel %vm1322_vm3, %v1297_v6, %v1293_v28  ;;  %v1309_v22 = vrot.slane %v1278_v45, %v1292_v49  ;;  %v2415_v6 = vsub.s32 %v2412_v58, %v3046_v21 }
 0x25a   : > { %v1275_v8 = vpop.permute.xlu0 %1274  ;;  %v1325_v24 = vsel %vm1324_vm4, %v1301_v7, %v1323_v19 }
 0x25b   : > { %v1305_v30 = vrot.slane %v1275_v8, %v1292_v49 }
 0x25c   : > { %v1284_v56 = vpop.permute.xlu1 %1283 }
 0x25d   : > { %v1327_v18 = vsel %vm1326_vm5, %v1305_v30, %v1325_v24  ;;  %v1317_v52 = vrot.slane %v1284_v56, %v1292_v49 }
 0x25e   : > { %v1281_v44 = vpop.permute.xlu0 %1280  ;;  %v1329_v47 = vsel %vm1328_vm6, %v1309_v22, %v1327_v18 }
 0x25f   : > { %v1313_v20 = vrot.slane %v1281_v44, %v1292_v49 }
 0x261   : > { %v1331_v33 = vsel %vm1330_vm7, %v1313_v20, %v1329_v47 }
 0x262   : > { %v1287_v23 = vpop.permute.xlu0 %1286  ;;  %v1333_v14 = vsel %vm1332_vm8, %v1317_v52, %v1331_v33 }
 0x263   : > { %v1321_v54 = vrot.slane %v1287_v23, %v1292_v49 }
 0x265   : > { %v1335_v59 = vsel %vm1334_vm9, %v1321_v54, %v1333_v14 }
 0x266   : > { %1338 = vst.msk [vmem:[%s3472_s12] sm:$0xff] %vm1337_vm10, %v1335_v59 }
 0x296   : > { %v1646_v61 = vpop.permute.xlu1 %1645 }
 0x297   : > { %v1672_v3 = vrot.slane %v1646_v61, %v1671_v0 }
 0x298   : > { %v1649_v46 = vpop.permute.xlu0 %1648 }
 0x299   : > { %v1676_v31 = vrot.slane %v1649_v46, %v1671_v0 }
 0x29b   : > { %v1701_v53 = vsel %vm1322_vm3, %v1676_v31, %v1672_v3 }
 0x29c   : > { %v1655_v16 = vpop.permute.xlu0 %1654  ;;  %v1652_v63 = vpop.permute.xlu1 %1651 }
 0x29d   : > { %v1680_v55 = vrot.slane %v1652_v63, %v1671_v0  ;;  %v1684_v32 = vrot.slane %v1655_v16, %v1671_v0 }
 0x29f   : > { %v1702_v25 = vsel %vm1324_vm4, %v1680_v55, %v1701_v53 }
 0x2a0   : > { %v1661_v9 = vpop.permute.xlu0 %1660  ;;  %v1658_v10 = vpop.permute.xlu1 %1657  ;;  %v1703_v60 = vsel %vm1326_vm5, %v1684_v32, %v1702_v25 }
 0x2a1   : > { %v1688_v38 = vrot.slane %v1658_v10, %v1671_v0  ;;  %v1692_v12 = vrot.slane %v1661_v9, %v1671_v0 }
 0x2a3   : > { %v1704_v5 = vsel %vm1328_vm6, %v1688_v38, %v1703_v60 }
 0x2a4   : > { %v1705_v62 = vsel %vm1330_vm7, %v1692_v12, %v1704_v5 }
 0x2ae   : > { %v1667_v39 = vpop.permute.xlu0 %1666 }
 0x2af   : > { %v1700_v2 = vrot.slane %v1667_v39, %v1671_v0 }
 0x2b0   : > { %v1664_v15 = vpop.permute.xlu1 %1663 }
 0x2b1   : > { %v1696_v26 = vrot.slane %v1664_v15, %v1671_v0 }
 0x2b3   : > { %v1706_v48 = vsel %vm1332_vm8, %v1696_v26, %v1705_v62 }
 0x2b4   : > { %v1707_v29 = vsel %vm1334_vm9, %v1700_v2, %v1706_v48  ;;  %v2018_v1 = vpop.permute.xlu1 %2017  ;;  %v2021_v17 = vpop.permute.xlu0 %2020 }
 0x2b5   : > { %1710 = vst.msk [vmem:[%s3472_s12] sm:$0xff] %vm1709_vm11, %v1707_v29  ;;  %v2048_v4 = vrot.slane %v2021_v17, %v2043_v37  ;;  %v2044_v43 = vrot.slane %v2018_v1, %v2043_v37 }
 0x2b7   : > { %v2073_v28 = vsel %vm1322_vm3, %v2048_v4, %v2044_v43 }
 0x2b8   : > { %v2024_v34 = vpop.permute.xlu1 %2023 }
 0x2b9   : > { %v2052_v13 = vrot.slane %v2024_v34, %v2043_v37 }
 0x2bb   : > { %v2074_v19 = vsel %vm1324_vm4, %v2052_v13, %v2073_v28 }
 0x2bc   : > { %v2030_v35 = vpop.permute.xlu0 %2029 }
 0x2bd   : > { %v2060_v42 = vrot.slane %v2030_v35, %v2043_v37 }
 0x2c0   : > { %v2027_v57 = vpop.permute.xlu0 %2026  ;;  %v2390_v36 = vpop.permute.xlu1 %2389 }
 0x2c1   : > { %v2056_v11 = vrot.slane %v2027_v57, %v2043_v37  ;;  %v2416_v30 = vrot.slane %v2390_v36, %v2415_v6 }
 0x2c3   : > { %v2075_v8 = vsel %vm1326_vm5, %v2056_v11, %v2074_v19 }
 0x2c4   : > { %v2033_v40 = vpop.permute.xlu0 %2032  ;;  %v2396_v41 = vpop.permute.xlu1 %2395  ;;  %v2076_v21 = vsel %vm1328_vm6, %v2060_v42, %v2075_v8 }
 0x2c5   : > { %v2064_v24 = vrot.slane %v2033_v40, %v2043_v37  ;;  %v2424_v22 = vrot.slane %v2396_v41, %v2415_v6 }
 0x2c7   : > { %v2077_v23 = vsel %vm1330_vm7, %v2064_v24, %v2076_v21 }
 0x2c8   : > { %v2036_v49 = vpop.permute.xlu0 %2035  ;;  %v2402_v50 = vpop.permute.xlu1 %2401 }
 0x2c9   : > { %v2068_v44 = vrot.slane %v2036_v49, %v2043_v37  ;;  %v2432_v54 = vrot.slane %v2402_v50, %v2415_v6 }
 0x2cb   : > { %v2078_v46 = vsel %vm1332_vm8, %v2068_v44, %v2077_v23 }
 0x2cc   : > { %v2393_v45 = vpop.permute.xlu0 %2392  ;;  %v2399_v7 = vpop.permute.xlu1 %2398 }
 0x2cd   : > { %v2420_v18 = vrot.slane %v2393_v45, %v2415_v6  ;;  %v2428_v20 = vrot.slane %v2399_v7, %v2415_v6 }
 0x2cf   : > { %v2445_v56 = vsel %vm1322_vm3, %v2420_v18, %v2416_v30 }
 0x2d0   : > { %v2446_v47 = vsel %vm1324_vm4, %v2424_v22, %v2445_v56  ;;  %v2039_v33 = vpop.permute.xlu0 %2038  ;;  %v2405_v52 = vpop.permute.xlu1 %2404 }
 0x2d1   : > { %v2447_v14 = vsel %vm1326_vm5, %v2428_v20, %v2446_v47  ;;  %v2072_v59 = vrot.slane %v2039_v33, %v2043_v37  ;;  %v2436_v61 = vrot.slane %v2405_v52, %v2415_v6 }
 0x2d2   : > { %v2448_v16 = vsel %vm1328_vm6, %v2432_v54, %v2447_v14 }
 0x2d3   : > { %v2079_v51 = vsel %vm1334_vm9, %v2072_v59, %v2078_v46  ;;  %v2449_v3 = vsel %vm1330_vm7, %v2436_v61, %v2448_v16 }
 0x2d4   : > { %2082 = vst.msk [vmem:[%s3472_s12] sm:$0xff] %vm2081_vm12, %v2079_v51  ;;  %v2411_v63 = vpop.permute.xlu0 %2410  ;;  %v2408_v0 = vpop.permute.xlu1 %2407 }
 0x2d5   : > { %v2444_v31 = vrot.slane %v2411_v63, %v2415_v6  ;;  %v2440_v55 = vrot.slane %v2408_v0, %v2415_v6 }
 0x2d7   : > { %v2450_v9 = vsel %vm1332_vm8, %v2440_v55, %v2449_v3 }
 0x2d8   : > { %v2451_v10 = vsel %vm1334_vm9, %v2444_v31, %v2450_v9 }
 0x2d9   : > { %2454 = vst.msk [vmem:[%s3472_s12] sm:$0xff] %vm2453_vm13, %v2451_v10 }
 0x2da PF: > { %s18_s29 = sadd.s32 1, %s2864_s29   ;;  %s3525_s27 = smov %s2860_s28 }
 0x2db   : > { %p15_p5 = scmp.ge.s32.totalorder %s18_s29, 4   ;;  %s3526_s28 = smov %s3528_s30 }
 0x2dd   :  { %17 = sbr.rel (!%p15_p5) target bundleno = 2 (0x2), region = 105 }

</bundles_post_ra>
